<compile_context>
chip_gen: v5e
topology: v5e:2x2
jax: 0.10.0
libtpu: 0.0.40
codegen_flags: <defaults>
</compile_context>

<pallas_src>
import functools
import math

import jax
import jax.numpy as jnp
from jax.experimental import pallas as pl
from jax.experimental.pallas import tpu as pltpu


def _pick_tile(s):
    """Largest MXU/lane-friendly tile that divides the sequence length.

    256 amortizes the ~0.35us/grid-step overhead on v6e/v7x; 128 already saturates
    v5e's 4x128^2 MXU.  Small sequences fall back to a single tile.  Re-derive
    downward on v7x if the resident set approaches its 64 MiB VMEM.
    """
    for t in (256, 128):
        if s % t == 0:
            return t
    # TODO(synk): pad ragged sequence lengths to a tile multiple instead of
    # falling back to one full-length tile.
    return s


def _mha_flash_kernel(num_heads, d_k, scale, with_attn, *refs):
    """Fused QKV projections + flash attention + output projection.

    Grid: (batch, q_tile, kv_tile); the kv axis is the innermost reduction axis.

    refs layout:
      inputs : q, k, v           [1, TQ|TK, D]
               Wq, Wk, Wv, Wo    [D, D]        (x @ W + b convention)
               bq, bk, bv, bo    [1, D]
      outputs: out               [1, TQ, D]
               ctx (optional)    [1, TQ, D]    lane-dense combined-heads attention
      scratch: q_sc              [H, TQ, d_k]  projected + scaled q tile
               k_sc, v_sc        [H, TK, d_k]  projected k/v tile
               m_sc, l_sc        [H, TQ, 1]    online-softmax running max / sum
               acc_sc            [H, TQ, d_k]  un-normalized output accumulator
               cmb_sc            [TQ, D]       combined-heads assembly buffer
    """
    (q_ref, k_ref, v_ref,
     wq_ref, wk_ref, wv_ref, wo_ref,
     bq_ref, bk_ref, bv_ref, bo_ref) = refs[:11]
    n_out = 2 if with_attn else 1
    out_ref = refs[11]
    ctx_ref = refs[12] if with_attn else None
    q_sc, k_sc, v_sc, m_sc, l_sc, acc_sc, cmb_sc = refs[11 + n_out:]

    ki = pl.program_id(2)

    @pl.when(ki == 0)
    def _init():
        # Q projection hoisted out of the KV loop: computed once per (b, q-tile),
        # reused across every KV step; 1/sqrt(d_k) folded into q here.
        q = jnp.dot(q_ref[0], wq_ref[...],
                    preferred_element_type=jnp.float32) + bq_ref[...]
        q = q * scale
        for h in range(num_heads):
            q_sc[h] = q[:, h * d_k:(h + 1) * d_k]
        m_sc[...] = jnp.full_like(m_sc, -jnp.inf)
        l_sc[...] = jnp.zeros_like(l_sc)
        acc_sc[...] = jnp.zeros_like(acc_sc)

    # Project this K/V tile (MXU, f32 accumulation) and split heads into scratch.
    # TODO(synk): for nq > 1 this re-projects K/V once per q tile; a separate
    # projection pass (or streaming pre-projected K/V tiles) would avoid that.
    k = jnp.dot(k_ref[0], wk_ref[...],
                preferred_element_type=jnp.float32) + bk_ref[...]
    v = jnp.dot(v_ref[0], wv_ref[...],
                preferred_element_type=jnp.float32) + bv_ref[...]
    for h in range(num_heads):
        lo = h * d_k
        k_sc[h] = k[:, lo:lo + d_k]
        v_sc[h] = v[:, lo:lo + d_k]

    q_all = q_sc[...]            # [H, TQ, d_k]
    k_all = k_sc[...]            # [H, TK, d_k]
    v_all = v_sc[...]            # [H, TK, d_k]

    # Head-batched scores; dot_general contracts the last dims directly, so no
    # K transpose is ever materialized.  (Scale already folded into q.)
    s = jnp.einsum('hqd,hkd->hqk', q_all, k_all,
                   preferred_element_type=jnp.float32)           # [H, TQ, TK]
    # TODO(synk): optional boolean mask (masked_fill with -10000.0) not wired up;
    # the module's forward is exercised with mask=None.

    # Online softmax update (flash-attention style).
    m_prev = m_sc[...]
    m_new = jnp.maximum(m_prev, jnp.max(s, axis=-1, keepdims=True))
    alpha = jnp.exp(m_prev - m_new)
    p = jnp.exp(s - m_new)                                       # [H, TQ, TK]
    # TODO(synk): nn.Dropout(p=0.1) on attn_probs omitted (inference/eval mode).
    l_sc[...] = alpha * l_sc[...] + jnp.sum(p, axis=-1, keepdims=True)
    acc_sc[...] = alpha * acc_sc[...] + jnp.einsum(
        'hqk,hkd->hqd', p.astype(v_all.dtype), v_all,
        preferred_element_type=jnp.float32)
    m_sc[...] = m_new

    @pl.when(ki == pl.num_programs(2) - 1)
    def _finalize():
        # EUP reciprocal keeps the softmax divide off the VALU.
        inv_l = pl.reciprocal(l_sc[...], approx=True)            # [H, TQ, 1]
        ctx = acc_sc[...] * inv_l                                # [H, TQ, d_k]
        # Assemble the lane-dense combined-heads tile once in VMEM scratch so
        # W_o is a single dense [TQ,D]x[D,D] MXU matmul and both HBM outputs
        # are single dense [1, TQ, D] stores.
        for h in range(num_heads):
            cmb_sc[:, h * d_k:(h + 1) * d_k] = ctx[h]
        combined = cmb_sc[...]                                   # [TQ, D]
        out = jnp.dot(combined, wo_ref[...],
                      preferred_element_type=jnp.float32) + bo_ref[...]
        out_ref[0] = out.astype(out_ref.dtype)
        if with_attn:
            ctx_ref[0] = combined.astype(ctx_ref.dtype)


def multi_head_attention_forward(Q, K, V, params, num_heads, *,
                                 return_attn=True, tq=None, tk=None):
    """params = (Wq, bq, Wk, bk, Wv, bv, Wo, bo); W: [D_in, D_out], b: [D].

    Returns (output, attn_output) like the PyTorch module (attn_output is
    [B, H, S, d_k]).  With return_attn=False only `output` is produced,
    halving HBM writeback when the caller ignores attn_output.
    """
    B, S, D = Q.shape
    assert K.shape == (B, S, D) and V.shape == (B, S, D)
    assert D % num_heads == 0, "d_model must be divisible by num_heads"
    d_k = D // num_heads
    scale = 1.0 / math.sqrt(d_k)

    TQ = tq if tq is not None else _pick_tile(S)
    TK = tk if tk is not None else _pick_tile(S)
    assert S % TQ == 0 and S % TK == 0, "sequence length must divide the tiles"
    nq, nk = S // TQ, S // TK

    Wq, bq, Wk, bk, Wv, bv, Wo, bo = params
    bq2, bk2, bv2, bo2 = (b.reshape(1, D) for b in (bq, bk, bv, bo))

    # TODO(synk): when Q is K is V (self-attention) the activation could be passed
    # once with Wq|Wk|Wv concatenated into a single [D, 3D] weight to cut the
    # activation HBM reads 3x.
    # TODO(synk): for bf16 models, keep the k/v scratch and probs in bf16 at the
    # MXU boundaries (softmax statistics stay f32).

    q_spec = pl.BlockSpec((1, TQ, D), lambda b, qi, ki: (b, qi, 0))
    kv_spec = pl.BlockSpec((1, TK, D), lambda b, qi, ki: (b, ki, 0))
    w_spec = pl.BlockSpec((D, D), lambda b, qi, ki: (0, 0))      # resident weights
    bias_spec = pl.BlockSpec((1, D), lambda b, qi, ki: (0, 0))   # resident biases

    out_shape = [jax.ShapeDtypeStruct((B, S, D), Q.dtype)]
    out_specs = [pl.BlockSpec((1, TQ, D), lambda b, qi, ki: (b, qi, 0))]
    if return_attn:
        # Lane-dense combined-heads layout; reshaped to [B, H, S, d_k] below.
        out_shape.append(jax.ShapeDtypeStruct((B, S, D), Q.dtype))
        out_specs.append(pl.BlockSpec((1, TQ, D), lambda b, qi, ki: (b, qi, 0)))

    kernel = functools.partial(_mha_flash_kernel, num_heads, d_k, scale,
                               return_attn)

    results = pl.pallas_call(
        kernel,
        out_shape=tuple(out_shape),
        grid=(B, nq, nk),
        in_specs=[q_spec, kv_spec, kv_spec,
                  w_spec, w_spec, w_spec, w_spec,
                  bias_spec, bias_spec, bias_spec, bias_spec],
        out_specs=tuple(out_specs),
        scratch_shapes=[
            pltpu.VMEM((num_heads, TQ, d_k), jnp.float32),   # q_sc
            pltpu.VMEM((num_heads, TK, d_k), jnp.float32),   # k_sc
            pltpu.VMEM((num_heads, TK, d_k), jnp.float32),   # v_sc
            pltpu.VMEM((num_heads, TQ, 1), jnp.float32),     # m_sc (running max)
            pltpu.VMEM((num_heads, TQ, 1), jnp.float32),     # l_sc (running sum)
            pltpu.VMEM((num_heads, TQ, d_k), jnp.float32),   # acc_sc
            pltpu.VMEM((TQ, D), jnp.float32),                # cmb_sc (combined heads)
        ],
        compiler_params=pltpu.CompilerParams(
            # Batch and q-tile axes are independent ("parallel" -> megacore / v7x
            # dual-TC sharding); the KV axis carries the online-softmax state and
            # must stay sequential ("arbitrary", innermost).
            dimension_semantics=("parallel", "parallel", "arbitrary"),
            # Raise the scoped VMEM limit above the 16/32 MiB defaults; the tile
            # choice keeps the resident set well under v7x's 64 MiB physical VMEM.
            vmem_limit_bytes=64 * 1024 * 1024,
        ),
    )(Q, K, V, Wq, Wk, Wv, Wo, bq2, bk2, bv2, bo2)

    if not isinstance(results, (tuple, list)):
        results = (results,)
    out = results[0]
    if not return_attn:
        return out
    ctx = results[1]                      # [B, S, D] combined-heads, lane-dense
    attn = ctx.reshape(B, S, num_heads, d_k).transpose(0, 2, 1, 3)
    return out, attn


def _reference_mha(Q, K, V, params, num_heads):
    """Pure-JAX reference with identical semantics to the PyTorch forward (eval mode)."""
    Wq, bq, Wk, bk, Wv, bv, Wo, bo = params
    B, S, D = Q.shape
    d_k = D // num_heads
    q = Q @ Wq + bq
    k = K @ Wk + bk
    v = V @ Wv + bv
    qh = q.reshape(B, S, num_heads, d_k).transpose(0, 2, 1, 3)
    kh = k.reshape(B, S, num_heads, d_k).transpose(0, 2, 1, 3)
    vh = v.reshape(B, S, num_heads, d_k).transpose(0, 2, 1, 3)
    scores = jnp.einsum("bhqd,bhkd->bhqk", qh, kh) / math.sqrt(d_k)
    probs = jax.nn.softmax(scores, axis=-1)
    attn = jnp.einsum("bhqk,bhkd->bhqd", probs, vh)              # [B, H, S, d_k]
    combined = attn.transpose(0, 2, 1, 3).reshape(B, S, D)
    out = combined @ Wo + bo
    return out, attn


if __name__ == "__main__":
    # Small shapes consistent with the module: [batch, seq_len, d_model], H heads.
    batch, seq, d_model, num_heads = 2, 8, 32, 4
    d_k = d_model // num_heads

    key = jax.random.PRNGKey(0)
    keys = jax.random.split(key, 11)

    Q = jax.random.normal(keys[0], (batch, seq, d_model), dtype=jnp.float32)
    K = jax.random.normal(keys[1], (batch, seq, d_model), dtype=jnp.float32)
    V = jax.random.normal(keys[2], (batch, seq, d_model), dtype=jnp.float32)

    # Deterministic "Linear" parameters in x @ W + b convention
    # (equivalent to a PyTorch Linear whose weight is W.T).
    init = 1.0 / math.sqrt(d_model)
    Wq = jax.random.uniform(keys[3], (d_model, d_model), jnp.float32, -init, init)
    Wk = jax.random.uniform(keys[4], (d_model, d_model), jnp.float32, -init, init)
    Wv = jax.random.uniform(keys[5], (d_model, d_model), jnp.float32, -init, init)
    Wo = jax.random.uniform(keys[6], (d_model, d_model), jnp.float32, -init, init)
    bq = jax.random.uniform(keys[7], (d_model,), jnp.float32, -init, init)
    bk = jax.random.uniform(keys[8], (d_model,), jnp.float32, -init, init)
    bv = jax.random.uniform(keys[9], (d_model,), jnp.float32, -init, init)
    bo = jax.random.uniform(keys[10], (d_model,), jnp.float32, -init, init)

    params = (Wq, bq, Wk, bk, Wv, bv, Wo, bo)

    out, attn = multi_head_attention_forward(Q, K, V, params, num_heads)
    out, attn = jax.block_until_ready((out, attn))

    ref_out, ref_attn = _reference_mha(Q, K, V, params, num_heads)

    assert out.shape == (batch, seq, d_model)
    assert attn.shape == (batch, num_heads, seq, d_k)
    # approx (EUP) reciprocal in the softmax denominator -> slightly looser tol.
    assert jnp.allclose(out, ref_out, atol=5e-3, rtol=5e-3), "output mismatch"
    assert jnp.allclose(attn, ref_attn, atol=5e-3, rtol=5e-3), "attn_output mismatch"

    # Output-only path (halves HBM writeback when attn_output is unused).
    out_only = multi_head_attention_forward(Q, K, V, params, num_heads,
                                            return_attn=False)
    out_only = jax.block_until_ready(out_only)
    assert jnp.allclose(out_only, ref_out, atol=5e-3, rtol=5e-3), "output-only mismatch"

    print("KERNEL_OK")
</pallas_src>

<mosaic_0001>
module attributes {stable_mosaic.version = 11 : i64} {
  func.func @_mha_flash_kernel(%arg0: i32, %arg1: i32, %arg2: i32, %arg3: memref<1x8x32xf32, #tpu.memory_space<vmem>>, %arg4: memref<1x8x32xf32, #tpu.memory_space<vmem>>, %arg5: memref<1x8x32xf32, #tpu.memory_space<vmem>>, %arg6: memref<32x32xf32, #tpu.memory_space<vmem>>, %arg7: memref<32x32xf32, #tpu.memory_space<vmem>>, %arg8: memref<32x32xf32, #tpu.memory_space<vmem>>, %arg9: memref<32x32xf32, #tpu.memory_space<vmem>>, %arg10: memref<1x32xf32, #tpu.memory_space<vmem>>, %arg11: memref<1x32xf32, #tpu.memory_space<vmem>>, %arg12: memref<1x32xf32, #tpu.memory_space<vmem>>, %arg13: memref<1x32xf32, #tpu.memory_space<vmem>>, %arg14: memref<1x8x32xf32, #tpu.memory_space<vmem>>, %arg15: memref<1x8x32xf32, #tpu.memory_space<vmem>>, %arg16: memref<4x8x8xf32, #tpu.memory_space<vmem>>, %arg17: memref<4x8x8xf32, #tpu.memory_space<vmem>>, %arg18: memref<4x8x8xf32, #tpu.memory_space<vmem>>, %arg19: memref<4x8x1xf32, #tpu.memory_space<vmem>>, %arg20: memref<4x8x1xf32, #tpu.memory_space<vmem>>, %arg21: memref<4x8x8xf32, #tpu.memory_space<vmem>>, %arg22: memref<8x32xf32, #tpu.memory_space<vmem>>) attributes {dimension_semantics = [#tpu.dimension_semantics<parallel>, #tpu.dimension_semantics<parallel>, #tpu.dimension_semantics<arbitrary>], iteration_bounds = array<i64: 2, 1, 1>, scalar_prefetch = 0 : i64, scratch_operands = 7 : i64, tpu.core_type = #tpu.core_type<tc>, window_params = [{transform_indices = @transform_0, window_bounds = array<i64: 1, 8, 32>}, {transform_indices = @transform_1, window_bounds = array<i64: 1, 8, 32>}, {transform_indices = @transform_2, window_bounds = array<i64: 1, 8, 32>}, {pipeline_mode = #tpu.pipeline_mode<synchronous>, transform_indices = @transform_3, window_bounds = array<i64: 32, 32>}, {pipeline_mode = #tpu.pipeline_mode<synchronous>, transform_indices = @transform_4, window_bounds = array<i64: 32, 32>}, {pipeline_mode = #tpu.pipeline_mode<synchronous>, transform_indices = @transform_5, window_bounds = array<i64: 32, 32>}, {pipeline_mode = #tpu.pipeline_mode<synchronous>, transform_indices = @transform_6, window_bounds = array<i64: 32, 32>}, {pipeline_mode = #tpu.pipeline_mode<synchronous>, transform_indices = @transform_7, window_bounds = array<i64: 1, 32>}, {pipeline_mode = #tpu.pipeline_mode<synchronous>, transform_indices = @transform_8, window_bounds = array<i64: 1, 32>}, {pipeline_mode = #tpu.pipeline_mode<synchronous>, transform_indices = @transform_9, window_bounds = array<i64: 1, 32>}, {pipeline_mode = #tpu.pipeline_mode<synchronous>, transform_indices = @transform_10, window_bounds = array<i64: 1, 32>}, {transform_indices = @transform_11, window_bounds = array<i64: 1, 8, 32>}, {transform_indices = @transform_12, window_bounds = array<i64: 1, 8, 32>}]} {
    %c0_i32 = arith.constant 0 : i32
    %0 = arith.cmpi eq, %arg2, %c0_i32 : i32
    %1 = arith.extui %0 : i1 to i32
    %c0_i32_0 = arith.constant 0 : i32
    %2 = arith.cmpi ne, %1, %c0_i32_0 : i32
    scf.if %2 {
      %c0_69 = arith.constant 0 : index
      %c0_70 = arith.constant 0 : index
      %c0_71 = arith.constant 0 : index
      %78 = vector.load %arg3[%c0_69, %c0_70, %c0_71] : memref<1x8x32xf32, #tpu.memory_space<vmem>>, vector<1x8x32xf32>
      %79 = vector.shape_cast %78 : vector<1x8x32xf32> to vector<8x32xf32>
      %c0_72 = arith.constant 0 : index
      %c0_73 = arith.constant 0 : index
      %80 = vector.load %arg6[%c0_72, %c0_73] : memref<32x32xf32, #tpu.memory_space<vmem>>, vector<32x32xf32>
      %cst_74 = arith.constant dense<0.000000e+00> : vector<8x32xf32>
      %81 = tpu.matmul %79, %80, %cst_74 {dimension_numbers = #tpu.dot_dimension_numbers<[1], [0], [0], [1], [0, 0, 1, 1], [], []>} : vector<8x32xf32>, vector<32x32xf32>, vector<8x32xf32> -> vector<8x32xf32>
      %c0_75 = arith.constant 0 : index
      %c0_76 = arith.constant 0 : index
      %82 = vector.load %arg10[%c0_75, %c0_76] : memref<1x32xf32, #tpu.memory_space<vmem>>, vector<1x32xf32>
      %83 = vector.broadcast %82 : vector<1x32xf32> to vector<8x32xf32>
      %84 = arith.addf %81, %83 : vector<8x32xf32>
      %cst_77 = arith.constant 0.353553385 : f32
      %85 = vector.broadcast %cst_77 : f32 to vector<8x32xf32>
      %86 = arith.mulf %84, %85 : vector<8x32xf32>
      %87 = vector.extract_strided_slice %86 {offsets = [0, 0], sizes = [8, 8], strides = [1, 1]} : vector<8x32xf32> to vector<8x8xf32>
      %c0_78 = arith.constant 0 : index
      %c0_79 = arith.constant 0 : index
      %c0_80 = arith.constant 0 : index
      %88 = vector.load %arg16[%c0_78, %c0_79, %c0_80] : memref<4x8x8xf32, #tpu.memory_space<vmem>>, vector<1x8x8xf32>
      %89 = vector.shape_cast %88 : vector<1x8x8xf32> to vector<8x8xf32>
      %90 = vector.shape_cast %87 : vector<8x8xf32> to vector<1x8x8xf32>
      tpu.vector_store %arg16[%c0_78, %c0_79, %c0_80], %90 {strides = array<i32>} : memref<4x8x8xf32, #tpu.memory_space<vmem>>, vector<1x8x8xf32>,
      %91 = vector.extract_strided_slice %86 {offsets = [0, 8], sizes = [8, 8], strides = [1, 1]} : vector<8x32xf32> to vector<8x8xf32>
      %c1_81 = arith.constant 1 : index
      %c0_82 = arith.constant 0 : index
      %c0_83 = arith.constant 0 : index
      %92 = vector.load %arg16[%c1_81, %c0_82, %c0_83] : memref<4x8x8xf32, #tpu.memory_space<vmem>>, vector<1x8x8xf32>
      %93 = vector.shape_cast %92 : vector<1x8x8xf32> to vector<8x8xf32>
      %94 = vector.shape_cast %91 : vector<8x8xf32> to vector<1x8x8xf32>
      tpu.vector_store %arg16[%c1_81, %c0_82, %c0_83], %94 {strides = array<i32>} : memref<4x8x8xf32, #tpu.memory_space<vmem>>, vector<1x8x8xf32>,
      %95 = vector.extract_strided_slice %86 {offsets = [0, 16], sizes = [8, 8], strides = [1, 1]} : vector<8x32xf32> to vector<8x8xf32>
      %c2_84 = arith.constant 2 : index
      %c0_85 = arith.constant 0 : index
      %c0_86 = arith.constant 0 : index
      %96 = vector.load %arg16[%c2_84, %c0_85, %c0_86] : memref<4x8x8xf32, #tpu.memory_space<vmem>>, vector<1x8x8xf32>
      %97 = vector.shape_cast %96 : vector<1x8x8xf32> to vector<8x8xf32>
      %98 = vector.shape_cast %95 : vector<8x8xf32> to vector<1x8x8xf32>
      tpu.vector_store %arg16[%c2_84, %c0_85, %c0_86], %98 {strides = array<i32>} : memref<4x8x8xf32, #tpu.memory_space<vmem>>, vector<1x8x8xf32>,
      %99 = vector.extract_strided_slice %86 {offsets = [0, 24], sizes = [8, 8], strides = [1, 1]} : vector<8x32xf32> to vector<8x8xf32>
      %c3_87 = arith.constant 3 : index
      %c0_88 = arith.constant 0 : index
      %c0_89 = arith.constant 0 : index
      %100 = vector.load %arg16[%c3_87, %c0_88, %c0_89] : memref<4x8x8xf32, #tpu.memory_space<vmem>>, vector<1x8x8xf32>
      %101 = vector.shape_cast %100 : vector<1x8x8xf32> to vector<8x8xf32>
      %102 = vector.shape_cast %99 : vector<8x8xf32> to vector<1x8x8xf32>
      tpu.vector_store %arg16[%c3_87, %c0_88, %c0_89], %102 {strides = array<i32>} : memref<4x8x8xf32, #tpu.memory_space<vmem>>, vector<1x8x8xf32>,
      %cst_90 = arith.constant 0xFF800000 : f32
      %103 = vector.broadcast %cst_90 : f32 to vector<4x8x1xf32>
      %c0_91 = arith.constant 0 : index
      %c0_92 = arith.constant 0 : index
      %c0_93 = arith.constant 0 : index
      %104 = vector.load %arg19[%c0_91, %c0_92, %c0_93] : memref<4x8x1xf32, #tpu.memory_space<vmem>>, vector<4x8x1xf32>
      tpu.vector_store %arg19[%c0_91, %c0_92, %c0_93], %103 {strides = array<i32>} : memref<4x8x1xf32, #tpu.memory_space<vmem>>, vector<4x8x1xf32>,
      %cst_94 = arith.constant 0.000000e+00 : f32
      %105 = vector.broadcast %cst_94 : f32 to vector<4x8x1xf32>
      %c0_95 = arith.constant 0 : index
      %c0_96 = arith.constant 0 : index
      %c0_97 = arith.constant 0 : index
      %106 = vector.load %arg20[%c0_95, %c0_96, %c0_97] : memref<4x8x1xf32, #tpu.memory_space<vmem>>, vector<4x8x1xf32>
      tpu.vector_store %arg20[%c0_95, %c0_96, %c0_97], %105 {strides = array<i32>} : memref<4x8x1xf32, #tpu.memory_space<vmem>>, vector<4x8x1xf32>,
      %cst_98 = arith.constant 0.000000e+00 : f32
      %107 = vector.broadcast %cst_98 : f32 to vector<4x8x8xf32>
      %c0_99 = arith.constant 0 : index
      %c0_100 = arith.constant 0 : index
      %c0_101 = arith.constant 0 : index
      %108 = vector.load %arg21[%c0_99, %c0_100, %c0_101] : memref<4x8x8xf32, #tpu.memory_space<vmem>>, vector<4x8x8xf32>
      tpu.vector_store %arg21[%c0_99, %c0_100, %c0_101], %107 {strides = array<i32>} : memref<4x8x8xf32, #tpu.memory_space<vmem>>, vector<4x8x8xf32>,
    } else {
    }
    %c0 = arith.constant 0 : index
    %c0_1 = arith.constant 0 : index
    %c0_2 = arith.constant 0 : index
    %3 = vector.load %arg4[%c0, %c0_1, %c0_2] : memref<1x8x32xf32, #tpu.memory_space<vmem>>, vector<1x8x32xf32>
    %4 = vector.shape_cast %3 : vector<1x8x32xf32> to vector<8x32xf32>
    %c0_3 = arith.constant 0 : index
    %c0_4 = arith.constant 0 : index
    %5 = vector.load %arg7[%c0_3, %c0_4] : memref<32x32xf32, #tpu.memory_space<vmem>>, vector<32x32xf32>
    %cst = arith.constant dense<0.000000e+00> : vector<8x32xf32>
    %6 = tpu.matmul %4, %5, %cst {dimension_numbers = #tpu.dot_dimension_numbers<[1], [0], [0], [1], [0, 0, 1, 1], [], []>} : vector<8x32xf32>, vector<32x32xf32>, vector<8x32xf32> -> vector<8x32xf32>
    %c0_5 = arith.constant 0 : index
    %c0_6 = arith.constant 0 : index
    %7 = vector.load %arg11[%c0_5, %c0_6] : memref<1x32xf32, #tpu.memory_space<vmem>>, vector<1x32xf32>
    %8 = vector.broadcast %7 : vector<1x32xf32> to vector<8x32xf32>
    %9 = arith.addf %6, %8 : vector<8x32xf32>
    %c0_7 = arith.constant 0 : index
    %c0_8 = arith.constant 0 : index
    %c0_9 = arith.constant 0 : index
    %10 = vector.load %arg5[%c0_7, %c0_8, %c0_9] : memref<1x8x32xf32, #tpu.memory_space<vmem>>, vector<1x8x32xf32>
    %11 = vector.shape_cast %10 : vector<1x8x32xf32> to vector<8x32xf32>
    %c0_10 = arith.constant 0 : index
    %c0_11 = arith.constant 0 : index
    %12 = vector.load %arg8[%c0_10, %c0_11] : memref<32x32xf32, #tpu.memory_space<vmem>>, vector<32x32xf32>
    %cst_12 = arith.constant dense<0.000000e+00> : vector<8x32xf32>
    %13 = tpu.matmul %11, %12, %cst_12 {dimension_numbers = #tpu.dot_dimension_numbers<[1], [0], [0], [1], [0, 0, 1, 1], [], []>} : vector<8x32xf32>, vector<32x32xf32>, vector<8x32xf32> -> vector<8x32xf32>
    %c0_13 = arith.constant 0 : index
    %c0_14 = arith.constant 0 : index
    %14 = vector.load %arg12[%c0_13, %c0_14] : memref<1x32xf32, #tpu.memory_space<vmem>>, vector<1x32xf32>
    %15 = vector.broadcast %14 : vector<1x32xf32> to vector<8x32xf32>
    %16 = arith.addf %13, %15 : vector<8x32xf32>
    %17 = vector.extract_strided_slice %9 {offsets = [0, 0], sizes = [8, 8], strides = [1, 1]} : vector<8x32xf32> to vector<8x8xf32>
    %c0_15 = arith.constant 0 : index
    %c0_16 = arith.constant 0 : index
    %c0_17 = arith.constant 0 : index
    %18 = vector.load %arg17[%c0_15, %c0_16, %c0_17] : memref<4x8x8xf32, #tpu.memory_space<vmem>>, vector<1x8x8xf32>
    %19 = vector.shape_cast %18 : vector<1x8x8xf32> to vector<8x8xf32>
    %20 = vector.shape_cast %17 : vector<8x8xf32> to vector<1x8x8xf32>
    tpu.vector_store %arg17[%c0_15, %c0_16, %c0_17], %20 {strides = array<i32>} : memref<4x8x8xf32, #tpu.memory_space<vmem>>, vector<1x8x8xf32>,
    %21 = vector.extract_strided_slice %16 {offsets = [0, 0], sizes = [8, 8], strides = [1, 1]} : vector<8x32xf32> to vector<8x8xf32>
    %c0_18 = arith.constant 0 : index
    %c0_19 = arith.constant 0 : index
    %c0_20 = arith.constant 0 : index
    %22 = vector.load %arg18[%c0_18, %c0_19, %c0_20] : memref<4x8x8xf32, #tpu.memory_space<vmem>>, vector<1x8x8xf32>
    %23 = vector.shape_cast %22 : vector<1x8x8xf32> to vector<8x8xf32>
    %24 = vector.shape_cast %21 : vector<8x8xf32> to vector<1x8x8xf32>
    tpu.vector_store %arg18[%c0_18, %c0_19, %c0_20], %24 {strides = array<i32>} : memref<4x8x8xf32, #tpu.memory_space<vmem>>, vector<1x8x8xf32>,
    %25 = vector.extract_strided_slice %9 {offsets = [0, 8], sizes = [8, 8], strides = [1, 1]} : vector<8x32xf32> to vector<8x8xf32>
    %c1 = arith.constant 1 : index
    %c0_21 = arith.constant 0 : index
    %c0_22 = arith.constant 0 : index
    %26 = vector.load %arg17[%c1, %c0_21, %c0_22] : memref<4x8x8xf32, #tpu.memory_space<vmem>>, vector<1x8x8xf32>
    %27 = vector.shape_cast %26 : vector<1x8x8xf32> to vector<8x8xf32>
    %28 = vector.shape_cast %25 : vector<8x8xf32> to vector<1x8x8xf32>
    tpu.vector_store %arg17[%c1, %c0_21, %c0_22], %28 {strides = array<i32>} : memref<4x8x8xf32, #tpu.memory_space<vmem>>, vector<1x8x8xf32>,
    %29 = vector.extract_strided_slice %16 {offsets = [0, 8], sizes = [8, 8], strides = [1, 1]} : vector<8x32xf32> to vector<8x8xf32>
    %c1_23 = arith.constant 1 : index
    %c0_24 = arith.constant 0 : index
    %c0_25 = arith.constant 0 : index
    %30 = vector.load %arg18[%c1_23, %c0_24, %c0_25] : memref<4x8x8xf32, #tpu.memory_space<vmem>>, vector<1x8x8xf32>
    %31 = vector.shape_cast %30 : vector<1x8x8xf32> to vector<8x8xf32>
    %32 = vector.shape_cast %29 : vector<8x8xf32> to vector<1x8x8xf32>
    tpu.vector_store %arg18[%c1_23, %c0_24, %c0_25], %32 {strides = array<i32>} : memref<4x8x8xf32, #tpu.memory_space<vmem>>, vector<1x8x8xf32>,
    %33 = vector.extract_strided_slice %9 {offsets = [0, 16], sizes = [8, 8], strides = [1, 1]} : vector<8x32xf32> to vector<8x8xf32>
    %c2 = arith.constant 2 : index
    %c0_26 = arith.constant 0 : index
    %c0_27 = arith.constant 0 : index
    %34 = vector.load %arg17[%c2, %c0_26, %c0_27] : memref<4x8x8xf32, #tpu.memory_space<vmem>>, vector<1x8x8xf32>
    %35 = vector.shape_cast %34 : vector<1x8x8xf32> to vector<8x8xf32>
    %36 = vector.shape_cast %33 : vector<8x8xf32> to vector<1x8x8xf32>
    tpu.vector_store %arg17[%c2, %c0_26, %c0_27], %36 {strides = array<i32>} : memref<4x8x8xf32, #tpu.memory_space<vmem>>, vector<1x8x8xf32>,
    %37 = vector.extract_strided_slice %16 {offsets = [0, 16], sizes = [8, 8], strides = [1, 1]} : vector<8x32xf32> to vector<8x8xf32>
    %c2_28 = arith.constant 2 : index
    %c0_29 = arith.constant 0 : index
    %c0_30 = arith.constant 0 : index
    %38 = vector.load %arg18[%c2_28, %c0_29, %c0_30] : memref<4x8x8xf32, #tpu.memory_space<vmem>>, vector<1x8x8xf32>
    %39 = vector.shape_cast %38 : vector<1x8x8xf32> to vector<8x8xf32>
    %40 = vector.shape_cast %37 : vector<8x8xf32> to vector<1x8x8xf32>
    tpu.vector_store %arg18[%c2_28, %c0_29, %c0_30], %40 {strides = array<i32>} : memref<4x8x8xf32, #tpu.memory_space<vmem>>, vector<1x8x8xf32>,
    %41 = vector.extract_strided_slice %9 {offsets = [0, 24], sizes = [8, 8], strides = [1, 1]} : vector<8x32xf32> to vector<8x8xf32>
    %c3 = arith.constant 3 : index
    %c0_31 = arith.constant 0 : index
    %c0_32 = arith.constant 0 : index
    %42 = vector.load %arg17[%c3, %c0_31, %c0_32] : memref<4x8x8xf32, #tpu.memory_space<vmem>>, vector<1x8x8xf32>
    %43 = vector.shape_cast %42 : vector<1x8x8xf32> to vector<8x8xf32>
    %44 = vector.shape_cast %41 : vector<8x8xf32> to vector<1x8x8xf32>
    tpu.vector_store %arg17[%c3, %c0_31, %c0_32], %44 {strides = array<i32>} : memref<4x8x8xf32, #tpu.memory_space<vmem>>, vector<1x8x8xf32>,
    %45 = vector.extract_strided_slice %16 {offsets = [0, 24], sizes = [8, 8], strides = [1, 1]} : vector<8x32xf32> to vector<8x8xf32>
    %c3_33 = arith.constant 3 : index
    %c0_34 = arith.constant 0 : index
    %c0_35 = arith.constant 0 : index
    %46 = vector.load %arg18[%c3_33, %c0_34, %c0_35] : memref<4x8x8xf32, #tpu.memory_space<vmem>>, vector<1x8x8xf32>
    %47 = vector.shape_cast %46 : vector<1x8x8xf32> to vector<8x8xf32>
    %48 = vector.shape_cast %45 : vector<8x8xf32> to vector<1x8x8xf32>
    tpu.vector_store %arg18[%c3_33, %c0_34, %c0_35], %48 {strides = array<i32>} : memref<4x8x8xf32, #tpu.memory_space<vmem>>, vector<1x8x8xf32>,
    %c0_36 = arith.constant 0 : index
    %c0_37 = arith.constant 0 : index
    %c0_38 = arith.constant 0 : index
    %49 = vector.load %arg16[%c0_36, %c0_37, %c0_38] : memref<4x8x8xf32, #tpu.memory_space<vmem>>, vector<4x8x8xf32>
    %c0_39 = arith.constant 0 : index
    %c0_40 = arith.constant 0 : index
    %c0_41 = arith.constant 0 : index
    %50 = vector.load %arg17[%c0_39, %c0_40, %c0_41] : memref<4x8x8xf32, #tpu.memory_space<vmem>>, vector<4x8x8xf32>
    %c0_42 = arith.constant 0 : index
    %c0_43 = arith.constant 0 : index
    %c0_44 = arith.constant 0 : index
    %51 = vector.load %arg18[%c0_42, %c0_43, %c0_44] : memref<4x8x8xf32, #tpu.memory_space<vmem>>, vector<4x8x8xf32>
    "tpu.trace_start"() <{level = 10 : i32, message = "hqd,hkd->hqk"}> : () -> ()
    %cst_45 = arith.constant dense<0.000000e+00> : vector<4x8x8xf32>
    %52 = tpu.matmul %49, %50, %cst_45 {dimension_numbers = #tpu.dot_dimension_numbers<[2], [2], [1], [1], [0, 0, 0, 1, 1, 1], [0], [0]>} : vector<4x8x8xf32>, vector<4x8x8xf32>, vector<4x8x8xf32> -> vector<4x8x8xf32>
    "tpu.trace_stop"() : () -> ()
    %c0_46 = arith.constant 0 : index
    %c0_47 = arith.constant 0 : index
    %c0_48 = arith.constant 0 : index
    %53 = vector.load %arg19[%c0_46, %c0_47, %c0_48] : memref<4x8x1xf32, #tpu.memory_space<vmem>>, vector<4x8x1xf32>
    %cst_49 = arith.constant dense<0xFF800000> : vector<4x8xf32>
    %54 = vector.multi_reduction <maximumf>, %52, %cst_49 [2] : vector<4x8x8xf32> to vector<4x8xf32>
    %55 = vector.shape_cast %54 : vector<4x8xf32> to vector<4x8x1xf32>
    %56 = arith.maximumf %53, %55 : vector<4x8x1xf32>
    %57 = arith.subf %53, %56 : vector<4x8x1xf32>
    %58 = math.exp %57 : vector<4x8x1xf32>
    %59 = vector.broadcast %56 : vector<4x8x1xf32> to vector<4x8x8xf32>
    %60 = arith.subf %52, %59 : vector<4x8x8xf32>
    %61 = math.exp %60 : vector<4x8x8xf32>
    %c0_50 = arith.constant 0 : index
    %c0_51 = arith.constant 0 : index
    %c0_52 = arith.constant 0 : index
    %62 = vector.load %arg20[%c0_50, %c0_51, %c0_52] : memref<4x8x1xf32, #tpu.memory_space<vmem>>, vector<4x8x1xf32>
    %63 = arith.mulf %58, %62 : vector<4x8x1xf32>
    %cst_53 = arith.constant dense<0.000000e+00> : vector<4x8xf32>
    %64 = vector.multi_reduction <add>, %61, %cst_53 [2] : vector<4x8x8xf32> to vector<4x8xf32>
    %65 = vector.shape_cast %64 : vector<4x8xf32> to vector<4x8x1xf32>
    %66 = arith.addf %63, %65 : vector<4x8x1xf32>
    %c0_54 = arith.constant 0 : index
    %c0_55 = arith.constant 0 : index
    %c0_56 = arith.constant 0 : index
    %67 = vector.load %arg20[%c0_54, %c0_55, %c0_56] : memref<4x8x1xf32, #tpu.memory_space<vmem>>, vector<4x8x1xf32>
    tpu.vector_store %arg20[%c0_54, %c0_55, %c0_56], %66 {strides = array<i32>} : memref<4x8x1xf32, #tpu.memory_space<vmem>>, vector<4x8x1xf32>,
    %c0_57 = arith.constant 0 : index
    %c0_58 = arith.constant 0 : index
    %c0_59 = arith.constant 0 : index
    %68 = vector.load %arg21[%c0_57, %c0_58, %c0_59] : memref<4x8x8xf32, #tpu.memory_space<vmem>>, vector<4x8x8xf32>
    %69 = vector.broadcast %58 : vector<4x8x1xf32> to vector<4x8x8xf32>
    %70 = arith.mulf %69, %68 : vector<4x8x8xf32>
    "tpu.trace_start"() <{level = 10 : i32, message = "hqk,hkd->hqd"}> : () -> ()
    %cst_60 = arith.constant dense<0.000000e+00> : vector<4x8x8xf32>
    %71 = tpu.matmul %61, %51, %cst_60 {dimension_numbers = #tpu.dot_dimension_numbers<[2], [1], [1], [2], [0, 0, 0, 1, 1, 2], [0], [0]>} : vector<4x8x8xf32>, vector<4x8x8xf32>, vector<4x8x8xf32> -> vector<4x8x8xf32>
    "tpu.trace_stop"() : () -> ()
    %72 = arith.addf %70, %71 : vector<4x8x8xf32>
    %c0_61 = arith.constant 0 : index
    %c0_62 = arith.constant 0 : index
    %c0_63 = arith.constant 0 : index
    %73 = vector.load %arg21[%c0_61, %c0_62, %c0_63] : memref<4x8x8xf32, #tpu.memory_space<vmem>>, vector<4x8x8xf32>
    tpu.vector_store %arg21[%c0_61, %c0_62, %c0_63], %72 {strides = array<i32>} : memref<4x8x8xf32, #tpu.memory_space<vmem>>, vector<4x8x8xf32>,
    %c0_64 = arith.constant 0 : index
    %c0_65 = arith.constant 0 : index
    %c0_66 = arith.constant 0 : index
    %74 = vector.load %arg19[%c0_64, %c0_65, %c0_66] : memref<4x8x1xf32, #tpu.memory_space<vmem>>, vector<4x8x1xf32>
    tpu.vector_store %arg19[%c0_64, %c0_65, %c0_66], %56 {strides = array<i32>} : memref<4x8x1xf32, #tpu.memory_space<vmem>>, vector<4x8x1xf32>,
    %c0_i32_67 = arith.constant 0 : i32
    %75 = arith.cmpi eq, %arg2, %c0_i32_67 : i32
    %76 = arith.extui %75 : i1 to i32
    %c0_i32_68 = arith.constant 0 : i32
    %77 = arith.cmpi ne, %76, %c0_i32_68 : i32
    scf.if %77 {
      %c0_69 = arith.constant 0 : index
      %c0_70 = arith.constant 0 : index
      %c0_71 = arith.constant 0 : index
      %78 = vector.load %arg20[%c0_69, %c0_70, %c0_71] : memref<4x8x1xf32, #tpu.memory_space<vmem>>, vector<4x8x1xf32>
      %79 = tpu.reciprocal %78 {approx = true} : vector<4x8x1xf32> -> vector<4x8x1xf32>
      %c0_72 = arith.constant 0 : index
      %c0_73 = arith.constant 0 : index
      %c0_74 = arith.constant 0 : index
      %80 = vector.load %arg21[%c0_72, %c0_73, %c0_74] : memref<4x8x8xf32, #tpu.memory_space<vmem>>, vector<4x8x8xf32>
      %81 = vector.broadcast %79 : vector<4x8x1xf32> to vector<4x8x8xf32>
      %82 = arith.mulf %80, %81 : vector<4x8x8xf32>
      %83 = vector.extract_strided_slice %82 {offsets = [0, 0, 0], sizes = [1, 8, 8], strides = [1, 1, 1]} : vector<4x8x8xf32> to vector<1x8x8xf32>
      %84 = vector.shape_cast %83 : vector<1x8x8xf32> to vector<8x8xf32>
      %c0_75 = arith.constant 0 : index
      %c0_76 = arith.constant 0 : index
      %85 = vector.load %arg22[%c0_75, %c0_76] : memref<8x32xf32, #tpu.memory_space<vmem>>, vector<8x8xf32>
      tpu.vector_store %arg22[%c0_75, %c0_76], %84 {strides = array<i32>} : memref<8x32xf32, #tpu.memory_space<vmem>>, vector<8x8xf32>,
      %86 = vector.extract_strided_slice %82 {offsets = [1, 0, 0], sizes = [1, 8, 8], strides = [1, 1, 1]} : vector<4x8x8xf32> to vector<1x8x8xf32>
      %87 = vector.shape_cast %86 : vector<1x8x8xf32> to vector<8x8xf32>
      %c0_77 = arith.constant 0 : index
      %c8 = arith.constant 8 : index
      %88 = vector.load %arg22[%c0_77, %c8] : memref<8x32xf32, #tpu.memory_space<vmem>>, vector<8x8xf32>
      tpu.vector_store %arg22[%c0_77, %c8], %87 {strides = array<i32>} : memref<8x32xf32, #tpu.memory_space<vmem>>, vector<8x8xf32>,
      %89 = vector.extract_strided_slice %82 {offsets = [2, 0, 0], sizes = [1, 8, 8], strides = [1, 1, 1]} : vector<4x8x8xf32> to vector<1x8x8xf32>
      %90 = vector.shape_cast %89 : vector<1x8x8xf32> to vector<8x8xf32>
      %c0_78 = arith.constant 0 : index
      %c16 = arith.constant 16 : index
      %91 = vector.load %arg22[%c0_78, %c16] : memref<8x32xf32, #tpu.memory_space<vmem>>, vector<8x8xf32>
      tpu.vector_store %arg22[%c0_78, %c16], %90 {strides = array<i32>} : memref<8x32xf32, #tpu.memory_space<vmem>>, vector<8x8xf32>,
      %92 = vector.extract_strided_slice %82 {offsets = [3, 0, 0], sizes = [1, 8, 8], strides = [1, 1, 1]} : vector<4x8x8xf32> to vector<1x8x8xf32>
      %93 = vector.shape_cast %92 : vector<1x8x8xf32> to vector<8x8xf32>
      %c0_79 = arith.constant 0 : index
      %c24 = arith.constant 24 : index
      %94 = vector.load %arg22[%c0_79, %c24] : memref<8x32xf32, #tpu.memory_space<vmem>>, vector<8x8xf32>
      tpu.vector_store %arg22[%c0_79, %c24], %93 {strides = array<i32>} : memref<8x32xf32, #tpu.memory_space<vmem>>, vector<8x8xf32>,
      %c0_80 = arith.constant 0 : index
      %c0_81 = arith.constant 0 : index
      %95 = vector.load %arg22[%c0_80, %c0_81] : memref<8x32xf32, #tpu.memory_space<vmem>>, vector<8x32xf32>
      %c0_82 = arith.constant 0 : index
      %c0_83 = arith.constant 0 : index
      %96 = vector.load %arg9[%c0_82, %c0_83] : memref<32x32xf32, #tpu.memory_space<vmem>>, vector<32x32xf32>
      %cst_84 = arith.constant dense<0.000000e+00> : vector<8x32xf32>
      %97 = tpu.matmul %95, %96, %cst_84 {dimension_numbers = #tpu.dot_dimension_numbers<[1], [0], [0], [1], [0, 0, 1, 1], [], []>} : vector<8x32xf32>, vector<32x32xf32>, vector<8x32xf32> -> vector<8x32xf32>
      %c0_85 = arith.constant 0 : index
      %c0_86 = arith.constant 0 : index
      %98 = vector.load %arg13[%c0_85, %c0_86] : memref<1x32xf32, #tpu.memory_space<vmem>>, vector<1x32xf32>
      %99 = vector.broadcast %98 : vector<1x32xf32> to vector<8x32xf32>
      %100 = arith.addf %97, %99 : vector<8x32xf32>
      %c0_87 = arith.constant 0 : index
      %c0_88 = arith.constant 0 : index
      %c0_89 = arith.constant 0 : index
      %101 = vector.load %arg14[%c0_87, %c0_88, %c0_89] : memref<1x8x32xf32, #tpu.memory_space<vmem>>, vector<1x8x32xf32>
      %102 = vector.shape_cast %101 : vector<1x8x32xf32> to vector<8x32xf32>
      %103 = vector.shape_cast %100 : vector<8x32xf32> to vector<1x8x32xf32>
      tpu.vector_store %arg14[%c0_87, %c0_88, %c0_89], %103 {strides = array<i32>} : memref<1x8x32xf32, #tpu.memory_space<vmem>>, vector<1x8x32xf32>,
      %c0_90 = arith.constant 0 : index
      %c0_91 = arith.constant 0 : index
      %c0_92 = arith.constant 0 : index
      %104 = vector.load %arg15[%c0_90, %c0_91, %c0_92] : memref<1x8x32xf32, #tpu.memory_space<vmem>>, vector<1x8x32xf32>
      %105 = vector.shape_cast %104 : vector<1x8x32xf32> to vector<8x32xf32>
      %106 = vector.shape_cast %95 : vector<8x32xf32> to vector<1x8x32xf32>
      tpu.vector_store %arg15[%c0_90, %c0_91, %c0_92], %106 {strides = array<i32>} : memref<1x8x32xf32, #tpu.memory_space<vmem>>, vector<1x8x32xf32>,
    } else {
    }
    return
  }
  func.func @transform_0(%arg0: i32, %arg1: i32, %arg2: i32) -> (i32, i32, i32) {
    %c0_i32 = arith.constant 0 : i32
    %c0_i32_0 = arith.constant 0 : i32
    return %arg0, %arg1, %c0_i32 : i32, i32, i32
  }
  func.func @transform_1(%arg0: i32, %arg1: i32, %arg2: i32) -> (i32, i32, i32) {
    %c0_i32 = arith.constant 0 : i32
    %c0_i32_0 = arith.constant 0 : i32
    return %arg0, %arg2, %c0_i32 : i32, i32, i32
  }
  func.func @transform_2(%arg0: i32, %arg1: i32, %arg2: i32) -> (i32, i32, i32) {
    %c0_i32 = arith.constant 0 : i32
    %c0_i32_0 = arith.constant 0 : i32
    return %arg0, %arg2, %c0_i32 : i32, i32, i32
  }
  func.func @transform_3(%arg0: i32, %arg1: i32, %arg2: i32) -> (i32, i32) {
    %c0_i32 = arith.constant 0 : i32
    %c0_i32_0 = arith.constant 0 : i32
    %c0_i32_1 = arith.constant 0 : i32
    return %c0_i32, %c0_i32_0 : i32, i32
  }
  func.func @transform_4(%arg0: i32, %arg1: i32, %arg2: i32) -> (i32, i32) {
    %c0_i32 = arith.constant 0 : i32
    %c0_i32_0 = arith.constant 0 : i32
    %c0_i32_1 = arith.constant 0 : i32
    return %c0_i32, %c0_i32_0 : i32, i32
  }
  func.func @transform_5(%arg0: i32, %arg1: i32, %arg2: i32) -> (i32, i32) {
    %c0_i32 = arith.constant 0 : i32
    %c0_i32_0 = arith.constant 0 : i32
    %c0_i32_1 = arith.constant 0 : i32
    return %c0_i32, %c0_i32_0 : i32, i32
  }
  func.func @transform_6(%arg0: i32, %arg1: i32, %arg2: i32) -> (i32, i32) {
    %c0_i32 = arith.constant 0 : i32
    %c0_i32_0 = arith.constant 0 : i32
    %c0_i32_1 = arith.constant 0 : i32
    return %c0_i32, %c0_i32_0 : i32, i32
  }
  func.func @transform_7(%arg0: i32, %arg1: i32, %arg2: i32) -> (i32, i32) {
    %c0_i32 = arith.constant 0 : i32
    %c0_i32_0 = arith.constant 0 : i32
    %c0_i32_1 = arith.constant 0 : i32
    return %c0_i32, %c0_i32_0 : i32, i32
  }
  func.func @transform_8(%arg0: i32, %arg1: i32, %arg2: i32) -> (i32, i32) {
    %c0_i32 = arith.constant 0 : i32
    %c0_i32_0 = arith.constant 0 : i32
    %c0_i32_1 = arith.constant 0 : i32
    return %c0_i32, %c0_i32_0 : i32, i32
  }
  func.func @transform_9(%arg0: i32, %arg1: i32, %arg2: i32) -> (i32, i32) {
    %c0_i32 = arith.constant 0 : i32
    %c0_i32_0 = arith.constant 0 : i32
    %c0_i32_1 = arith.constant 0 : i32
    return %c0_i32, %c0_i32_0 : i32, i32
  }
  func.func @transform_10(%arg0: i32, %arg1: i32, %arg2: i32) -> (i32, i32) {
    %c0_i32 = arith.constant 0 : i32
    %c0_i32_0 = arith.constant 0 : i32
    %c0_i32_1 = arith.constant 0 : i32
    return %c0_i32, %c0_i32_0 : i32, i32
  }
  func.func @transform_11(%arg0: i32, %arg1: i32, %arg2: i32) -> (i32, i32, i32) {
    %c0_i32 = arith.constant 0 : i32
    %c0_i32_0 = arith.constant 0 : i32
    return %arg0, %arg1, %c0_i32 : i32, i32, i32
  }
  func.func @transform_12(%arg0: i32, %arg1: i32, %arg2: i32) -> (i32, i32, i32) {
    %c0_i32 = arith.constant 0 : i32
    %c0_i32_0 = arith.constant 0 : i32
    return %arg0, %arg1, %c0_i32 : i32, i32, i32
  }
}

</mosaic_0001>

<bundles_post_ra>
// kernel: tpu_custom_call.1
= control target key start
LH: loop header
LB: loop body
LE: loop exit
PB: predicated region body
PF: predicated region fallthrough
CT: control target
= control target key end

     0   :  { %s2443_s0 = inlined_call_operand.hbm [shape: f32[2,8,32], index: 0, kind: input, shape index: {}]   ;;  %s2444_s1 = inlined_call_operand.hbm [shape: f32[2,8,32], index: 1, kind: input, shape index: {}]   ;;  %s2445_s2 = inlined_call_operand.hbm [shape: f32[2,8,32], index: 2, kind: input, shape index: {}]   ;;  %s2446_s3 = inlined_call_operand.hbm [shape: f32[32,32], index: 3, kind: input, shape index: {}]   ;;  %s2447_s4 = inlined_call_operand.hbm [shape: f32[32,32], index: 4, kind: input, shape index: {}]   ;;  %s2448_s5 = inlined_call_operand.hbm [shape: f32[32,32], index: 5, kind: input, shape index: {}]   ;;  %s2449_s6 = inlined_call_operand.hbm [shape: f32[32,32], index: 6, kind: input, shape index: {}]   ;;  %s2450_s7 = inlined_call_operand.vmem [shape: f32[1,32], index: 7, kind: input, shape index: {}]   ;;  %s2451_s8 = inlined_call_operand.vmem [shape: f32[1,32], index: 8, kind: input, shape index: {}]   ;;  %s2452_s9 = inlined_call_operand.vmem [shape: f32[1,32], index: 9, kind: input, shape index: {}]   ;;  %s2453_s10 = inlined_call_operand.vmem [shape: f32[1,32], index: 10, kind: input, shape index: {}]   ;;  %s2454_s11 = inlined_call_operand.hbm [shape: f32[2,8,32], index: 11, kind: output, shape index: {0}]   ;;  %s2455_s12 = inlined_call_operand.hbm [shape: f32[2,8,32], index: 12, kind: output, shape index: {1}]  }
   0x1   :  { %2469 = sst [smem:[#allocation36_spill]] %s2443_s0 }
   0x2   :  { %2470 = sst [smem:[#allocation37_spill]] %s2444_s1 }
   0x3   :  { %2471 = sst [smem:[#allocation38_spill]] %s2446_s3 }
   0x4   :  { %2472 = sst [smem:[#allocation39_spill]] %s2447_s4 }
   0x5   :  { %2473 = sst [smem:[#allocation40_spill]] %s2448_s5 }
   0x6   :  { %2474 = sst [smem:[#allocation41_spill]] %s2449_s6 }
   0x7   :  { %2475 = sst [smem:[#allocation42_spill]] %s2453_s10 }
   0x8   :  { %2476 = sst [smem:[#allocation43_spill]] %s2454_s11 }
   0x9   :  { %2477 = sst [smem:[#allocation44_spill]] %s2455_s12 }
   0xa   :  { %18 = vsyncpa [#allocation10], 0 }
   0xb   :  { %20 = vsyncpa [#allocation10 + $0x1], 0 }
   0xc   :  { %21 = vsyncpa [#allocation13], 0 }
   0xd   :  { %23 = vsyncpa [#allocation13 + $0x1], 0 }
   0xe   :  { %24 = vsyncpa [#allocation16], 0 }
   0xf   :  { %25 = vsyncpa [#allocation19], 0 }
  0x10   :  { %26 = vsyncpa [#allocation11], 0 }
  0x11   :  { %28 = vsyncpa [#allocation11 + $0x1], 0 }
  0x12   :  { %29 = vsyncpa [#allocation23], 0 }
  0x13   :  { %31 = vsyncpa [#allocation23 + $0x1], 0  ;;  %s2078_s21 = smov 0   ;;  %s2080_s22 = smov 0  }
  0x14   :  { %s2082_s23 = smov 0   ;;  %s2084_s24 = smov 0  }
  0x15   :  { %s2086_s25 = smov 0   ;;  %s2088_s26 = smov 0  }
  0x16 LB: > { %2478 = sst [smem:[#allocation30_spill]] %s1976_s21  ;;  %s2109_s27 = sadd.s32 4294967295, %s1996_s26   ;;  %s1996_s26 = sphi %s2088_s26, %s37_s26   ;;  %s1992_s25 = sphi %s2086_s25, %s2508_s25   ;;  %s1988_s24 = sphi %s2084_s24, %s2507_s24   ;;  %s1984_s23 = sphi %s2082_s23, %s2511_s23   ;;  %s1980_s22 = sphi %s2080_s22, %s2510_s22   ;;  %s1976_s21 = sphi %s2078_s21, %s2509_s21  }
  0x17   : > { %2479 = sst [smem:[#allocation31_spill]] %s1992_s25  ;;  %p1456_p0 = scmp.ge.s32.totalorder %s1996_s26, 1 }
  0x18   : > { %2480 = sst [smem:[#allocation32_spill]] %s1996_s26  ;;  %p79_p1 = scmp.eq.s32.totalorder %s2109_s27, 0 }
  0x19   : > { %p369_p2 = scmp.lt.s32.totalorder %s1996_s26, 3  ;;  %s2481_s3 = sld [smem:[#allocation38_spill]] }
  0x1a   : > { %s1998_s14 = smov [#allocation15]   ;;  %p1461_p6 = scmp.ge.s32.totalorder %s1996_s26, 2 }
  0x1b   : > { %p2117_p3 = pnand %p1456_p0, %p369_p2  ;;  %s382_s15 = sshll.u32 %s1998_s14, 4  ;;  %s383_s15 = int_to_ptr.vmem [resolvable:$true] %s382_s15 }
  0x1c   : > { %s2484_s5 = sld [smem:[#allocation40_spill]]  ;;  %s2456_s20 = smov 128  }
  0x1d   : > { %p1526_p4 = pneg %p2117_p3  ;;  %s2458_s28 = smov 8  }
  0x1e   : > { %s2001_s29 = smov [#allocation18]   ;;  %s1455_s17 = sadd.s32 4294967294, %s1996_s26  }
  0x1f   : > { %s380_s30 = sshll.u32 %s2481_s3, 4  ;;  %p2125_p5 = pnand %p1526_p4, %p79_p1  ;;  %s381_s30 = int_to_ptr.hbm [resolvable:$true] %s380_s30 }
  0x20   : > { %s410_s14 = sshll.u32 %s2001_s29, 4  ;;  %s56_s18 = sadd.s32 1, %s1992_s25  ;;  %s411_s14 = int_to_ptr.vmem [resolvable:$true] %s410_s14 }
  0x21   : > { %1529 = dma.hbm_to_vmem [thread:$0]  (!%p2125_p5), %s381_s30, 512, %s383_s15, [#allocation16], %s2456_s20, %s2456_s20, %s2458_s28  }
  0x22   : > { %s408_s19 = sshll.u32 %s2484_s5, 4  ;;  %p58_p7 = scmp.ge.s32.totalorder %s56_s18, 2  ;;  %s409_s19 = int_to_ptr.hbm [resolvable:$true] %s408_s19 }
  0x23   : > { %1535 = dma.hbm_to_vmem [thread:$0]  (!%p2125_p5), %s409_s19, 512, %s411_s14, [#allocation19], %s2456_s20, %s2456_s20, %s2458_s28  }
  0x24   : > { %s65_s3 = sadd.s32 1, %s1984_s23  ;;  %p72_p8 = scmp.ne.s32.totalorder %s1984_s23, %s1980_s22 }
  0x25   : > { %p73_p9 = scmp.eq.s32.totalorder %s1996_s26, 0  ;;  %s2513_s18 = smov (%p58_p7, %s56_s18), 0 }
  0x26   : > { %2485 = sst [smem:[#allocation33_spill]] %s2513_s18  ;;  %p78_p11 = scmp.ne.s32.totalorder %s1980_s22, %s1976_s21 }
  0x27   : > { %p2151_p10 = por %p73_p9, %p72_p8  ;;  %s60_s15 = ssub.s32 %s1992_s25, %s2513_s18 }
  0x28   : > { %p328_p12 = scmp.eq.s32.totalorder %s2109_s27, 1  ;;  %p63_p13 = scmp.eq.s32.totalorder %s60_s15, 0 }
  0x29   : > { %p2162_p0 = por %p79_p1, %p78_p11  ;;  %p334_p4 = scmp.eq.s32.totalorder %s1455_s17, 1 }
  0x2a   : > { %p2166_p2 = por %p328_p12, %p72_p8  ;;  %p1560_p9 = scmp.lt.s32.totalorder %s1996_s26, 2 }
  0x2b   : > { %s2171_s14 = scalar_select %p63_p13, %s1984_s23, %s65_s3  }
  0x2c   : > { %p2173_p7 = por %p334_p4, %p78_p11  ;;  %s2464_s28 = sand.u32 1, %s1984_s23  }
  0x2d   : > { %2489 = sst [smem:[#allocation34_spill]] %s2171_s14  ;;  %s2180_s5 = sshll.u32 %s1992_s25, 3 }
  0x2e   : > { %s2490_s20 = scalar_select %p2173_p7, 1, 0 }
  0x2f   : > { %s2184_s15 = sshll.u32 %s2464_s28, 3  ;;  %p2188_p8 = pnand %p1560_p9, %p2151_p10 }
  0x30   : > { %2491 = sst [smem:[#allocation35_spill]] %s2490_s20  ;;  %s470_s3 = sand.u32 1, %s1996_s26  }
  0x31   : > { %s2493_s1 = sld [smem:[#allocation37_spill]]  ;;  %s474_s21 = scalar_lea.vmem [#allocation12], %s2184_s15 }
  0x32   : > { %s483_s25 = sshll.u32 %s474_s21, 4  ;;  %s2494_s4 = sld [smem:[#allocation39_spill]]  ;;  %s484_s25 = int_to_ptr.vmem [resolvable:$true] %s483_s25 }
  0x33   : > { %s471_s12 = scalar_lea.sflag [#allocation13], %s470_s3  ;;  %s2002_s26 = smov [#allocation17]  }
  0x34   : > { %s396_s14 = sshll.u32 %s2002_s26, 4  ;;  %s2495_s6 = sld [smem:[#allocation41_spill]]  ;;  %s397_s14 = int_to_ptr.vmem [resolvable:$true] %s396_s14 }
  0x35   : > { %s2497_s28 = smov 128   ;;  %s2003_s3 = smov [#allocation20]  }
  0x36   : > { %s2498_s0 = sld [smem:[#allocation36_spill]]  ;;  %s454_s17 = scalar_lea.vmem [#allocation9], %s2184_s15 }
  0x37   : > { %s479_s20 = scalar_lea.hbm %s2493_s1, %s2180_s5 }
  0x38   : > { %s481_s10 = sshll.u32 %s479_s20, 4  ;;  %s394_s11 = sshll.u32 %s2494_s4, 4  ;;  %s482_s10 = int_to_ptr.hbm [resolvable:$true] %s481_s10  ;;  %s395_s11 = int_to_ptr.hbm [resolvable:$true] %s394_s11 }
  0x39   : > { %1545 = dma.hbm_to_vmem [thread:$0]  (!%p2188_p8), %s482_s10, 128, %s484_s25, %s471_s12  }
  0x3a   : > { %s422_s21 = sshll.u32 %s2495_s6, 4  ;;  %s2496_s20 = smov 8   ;;  %s423_s21 = int_to_ptr.hbm [resolvable:$true] %s422_s21 }
  0x3b   : > { %1532 = dma.hbm_to_vmem [thread:$0]  (!%p2125_p5), %s395_s11, 512, %s397_s14, [#allocation16], %s2497_s28, %s2497_s28, %s2496_s20  }
  0x3c   : > { %s424_s10 = sshll.u32 %s2003_s3, 4  ;;  %s459_s26 = scalar_lea.hbm %s2498_s0, %s2180_s5  ;;  %s425_s10 = int_to_ptr.vmem [resolvable:$true] %s424_s10 }
  0x3d   : > { %1538 = dma.hbm_to_vmem [thread:$0]  (!%p2125_p5), %s423_s21, 512, %s425_s10, [#allocation19], %s2497_s28, %s2497_s28, %s2496_s20  }
  0x3e   : > { %s461_s1 = sshll.u32 %s459_s26, 4  ;;  %s463_s4 = sshll.u32 %s454_s17, 4  ;;  %s462_s1 = int_to_ptr.hbm [resolvable:$true] %s461_s1  ;;  %s464_s4 = int_to_ptr.vmem [resolvable:$true] %s463_s4 }
  0x3f   : > { %s2499_s6 = sand.u32 1, %s1984_s23   ;;  %s499_s25 = scalar_lea.hbm %s2445_s2, %s2180_s5 }
  0x40   : > { %s451_s11 = scalar_lea.sflag [#allocation10], %s2499_s6  ;;  %s501_s30 = sshll.u32 %s499_s25, 4  ;;  %s502_s30 = int_to_ptr.hbm [resolvable:$true] %s501_s30 }
  0x41   : > { %1542 = dma.hbm_to_vmem [thread:$0]  (!%p2188_p8), %s462_s1, 128, %s464_s4, %s451_s11  }
  0x42   : > { %s494_s0 = scalar_lea.vmem [#allocation14], %s2184_s15  ;;  %512 = sbr.rel (%p2117_p3) target bundleno = 1214 (0x4be), region = 64 }
  0x43   : > { %s503_s16 = sshll.u32 %s494_s0, 4  ;;  %s2235_s21 = sand.u32 (!%p2117_p3), 1, %s1980_s22   ;;  %s504_s16 = int_to_ptr.vmem [resolvable:$true] %s503_s16 }
  0x44   : > { %1548 = dma.hbm_to_vmem [thread:$0]  (!%p2188_p8), %s502_s30, 128, %s504_s16, %s471_s12  }
  0x45   : > { %s2238_s4 = sshll.u32 (!%p2117_p3), %s2235_s21, 3  ;;  %s515_s5 = scalar_lea.sflag (!%p2117_p3), [#allocation10], %s2235_s21 }
  0x46   : > { %s518_s6 = scalar_lea.vmem (!%p2117_p3), [#allocation9], %s2238_s4 }
  0x47   : > { %1951 = dma.done.wait (%p2162_p0), %s515_s5, 128  }
  0x48   : > { %1953 = vsyncadd (%p2162_p0), %s515_s5, 4294967168  ;;  %s524_s0 = sand.u32 1, %s2109_s27   ;;  %s528_s13 = scalar_lea.vmem [#allocation12], %s2238_s4 }
  0x49   : > { %s525_s12 = scalar_lea.sflag [#allocation13], %s524_s0 }
  0x4a   : > { %1955 = dma.done.wait (%p2162_p0), %s525_s12, 256  }
  0x4b   : > { %1957 = vsyncadd (%p2162_p0), %s525_s12, 4294967040  ;;  %s538_s18 = scalar_lea.vmem [#allocation14], %s2238_s4 }
  0x4c   : > { %1959 = dma.done.wait (%p79_p1), [#allocation16], 1024  }
  0x4d   : > { %1961 = vsyncadd (%p79_p1), [#allocation16], 4294966272 }
  0x4e   : > { %1963 = dma.done.wait (%p79_p1), [#allocation19], 1024  }
  0x4f   : > { %1965 = vsyncadd (%p79_p1), [#allocation19], 4294966272  ;;  %v623_v0 = vld [vmem:[#allocation15 + $0x18] sm:$0xff]  ;;  %v622_v2 = vld [vmem:[#allocation15 + $0x10] sm:$0xff]  ;;  %vm628_vm0 = vcmask 261120   ;;  %vm653_vm1 = vcmask 64512  }
  0x50   : > { %v688_v1 = vld [vmem:[#allocation17 + $0x18] sm:$0xff]  ;;  %644 = vmatpush.msra.mxu0 %v623_v0  ;;  %v687_v3 = vld [vmem:[#allocation17 + $0x10] sm:$0xff]  ;;  %v621_v4 = vld [vmem:[#allocation15 + $0x8] sm:$0xff]  ;;  %s2004_s28 = smov 112   ;;  %s2005_s10 = smov 120   ;;  %vm671_vm2 = vcmask 7168  }
  0x51   : > { %709 = vmatpush.msra.mxu1 %v688_v1  ;;  %v686_v5 = vld [vmem:[#allocation17 + $0x8] sm:$0xff]  ;;  %v620_v6 = vld [vmem:[#allocation15] sm:$0xff]  ;;  %v619_v8 = vld [vmem:[%s518_s6] sm:$0xff]  ;;  %s2006_s26 = smov 104   ;;  %v2007_v38 = vmov -inf   ;;  %v2008_v39 = vmov 0.0  }
  0x52   : > { %645 = vmatpush.msra.mxu0 %v622_v2  ;;  %v685_v7 = vld [vmem:[#allocation17] sm:$0xff]  ;;  %v1632_v10 = vld [vmem:[%s2450_s7] ss:$0 sm:$0xff]  ;;  %v721_v21 = vld [vmem:[#allocation18 + $0x18] sm:$0xff]  ;;  %672 = vst.msk [vmem:[#allocation5] sm:$0xff] %vm671_vm2, %v2007_v38  ;;  %v2009_v52 = vmov 0  }
  0x53   : > { %710 = vmatpush.msra.mxu1 %v687_v3  ;;  %v684_v9 = vld [vmem:[%s528_s13] sm:$0xff]  ;;  %v720_v22 = vld [vmem:[#allocation18 + $0x10] sm:$0xff]  ;;  %741 = vmatpush.msra.mxu2 %v721_v21  ;;  %673 = vst.msk [vmem:[#allocation5 + $0x8] sm:$0xff] %vm671_vm2, %v2007_v38  ;;  %s2010_s11 = smov 16   ;;  %s2011_s14 = smov 24   ;;  %vm1169_vm3 = vcmask 130112  }
  0x54   : > { %646 = vmatpush.msra.mxu0 %v621_v4  ;;  %v1633_v11 = vld [vmem:[%s2451_s8] ss:$0 sm:$0xff]  ;;  %v718_v26 = vld [vmem:[#allocation18] sm:$0xff]  ;;  %v717_v27 = vld [vmem:[%s538_s18] sm:$0xff]  ;;  %674 = vst.msk [vmem:[#allocation5 + $0x10] sm:$0xff] %vm671_vm2, %v2007_v38  ;;  %1630 = vset.pattern.permute.xlu2 %v2009_v52  ;;  %s2012_s3 = smov 8  }
  0x55   : > { %711 = vmatpush.msra.mxu1 %v686_v5  ;;  %v719_v25 = vld [vmem:[#allocation18 + $0x8] sm:$0xff]  ;;  %742 = vmatpush.msra.mxu2 %v720_v22  ;;  %675 = vst.msk [vmem:[#allocation5 + $0x18] sm:$0xff] %vm671_vm2, %v2007_v38  ;;  %vm1175_vm4 = vcmask 195712   ;;  %vm1181_vm5 = vcmask 261312   ;;  %s614_s25 = scalar_lea.vmem [#allocation22], %s2238_s4  ;;  %s1496_s30 = sshll.u32 %s1988_s24, 3 }
  0x56   : > { %647 = vmatpush.msra.mxu0 %v620_v6  ;;  %678 = vst.msk [vmem:[#allocation6 + $0x10] sm:$0xff] %vm671_vm2, %v2008_v39  ;;  %v1634_v40 = vld [vmem:[%s2452_s9] ss:$0 sm:$0xff]  ;;  %1631 = vset.pattern.permute.xlu1 %v2009_v52  ;;  %s2500_s6 = sld [smem:[#allocation44_spill]]  ;;  %s1251_s12 = sshll.u32 %s614_s25, 4  ;;  %s1252_s12 = int_to_ptr.vmem [resolvable:$true] %s1251_s12 }
  0x57   : > { %712 = vmatpush.msra.mxu1 %v685_v7  ;;  %1478 = vmatmul.msk.f32.vlgmr.msra.gmra.mxu0 %vm628_vm0, %v619_v8  ;;  %676 = vst.msk [vmem:[#allocation6] sm:$0xff] %vm671_vm2, %v2008_v39  ;;  %s1223_s18 = scalar_lea.sflag [#allocation23], %s2235_s21 }
  0x58   : > { %1479 = vmatmul.msk.f32.vlgmr.msra.gmra.mxu1 %vm628_vm0, %v684_v9  ;;  %743 = vmatpush.msra.mxu2 %v719_v25  ;;  %677 = vst.msk [vmem:[#allocation6 + $0x8] sm:$0xff] %vm671_vm2, %v2008_v39 }
  0x59   : > { %679 = vst.msk [vmem:[#allocation6 + $0x18] sm:$0xff] %vm671_vm2, %v2008_v39  ;;  %v2315_v45 = vld [vmem:[#allocation5] sm:$0xff]  ;;  %1629 = vset.pattern.permute.xlu0 %v2009_v52 }
  0x5a   : > { %744 = vmatpush.msra.mxu2 %v718_v26  ;;  %680 = vst.msk [vmem:[#allocation7] sm:$0xff] %vm653_vm1, %v2008_v39  ;;  %v901_v61 = vld [vmem:[#allocation5 + $0x8] sm:$0xff] }
  0x5b   : > { %1480 = vmatmul.msk.f32.vlgmr.msra.gmra.mxu2 %vm628_vm0, %v717_v27  ;;  %681 = vst.msk [vmem:[#allocation7 + $0x8] sm:$0xff] %vm653_vm1, %v2008_v39  ;;  %v2331_v54 = vld [vmem:[#allocation5 + $0x10] sm:$0xff] }
  0x5c   : > { %682 = vst.msk [vmem:[#allocation7 + $0x10] sm:$0xff] %vm653_vm1, %v2008_v39  ;;  %v2341_v58 = vld [vmem:[#allocation5 + $0x18] sm:$0xff]  ;;  %s1249_s0 = scalar_lea.hbm %s2500_s6, %s1496_s30  ;;  %s1890_s24 = scalar_lea.hbm %s2500_s6, 16 }
  0x5d   : > { %683 = vst.msk [vmem:[#allocation7 + $0x18] sm:$0xff] %vm653_vm1, %v2008_v39  ;;  %s1253_s13 = sshll.u32 %s1249_s0, 4  ;;  %s1254_s13 = int_to_ptr.hbm [resolvable:$true] %s1253_s13 }
  0x5e   : > { %s1884_s27 = sshra.s32 %s1254_s13, 4  ;;  %s1885_s27 = int_to_ptr.hbm [resolvable:$true] %s1884_s27 }
  0x5f   : > { %s1886_s19 = scalar_lea.hbm %s1885_s27, 8  ;;  %p1891_p10 = scmp.lt.s32.totalorder %s1885_s27, %s2500_s6 }
  0x60   : > { %p1887_p1 = scmp.ne.s32.totalorder %s1885_s27, %s1886_s19  ;;  %p1892_p11 = scmp.lt.s32.totalorder %s1890_s24, %s1886_s19 }
  0x62   : > { %p1888_p3 = pnand %p1887_p1, %p2166_p2  ;;  %p1893_p12 = por %p1892_p11, %p1891_p10 }
  0x63   : > { %v995_v52 = vld [vmem:[#allocation7 + $0x10] sm:$0xff] }
  0x64   : > { %p1889_p5 = pneg %p1888_p3 }
  0x66   : > { %p1894_p13 = pnand %p1893_p12, %p1889_p5 }
  0xd4   : > { %v649_v12 = vpop.f32.mrf.mxu0 }
  0xd5   : > { %v714_v13 = vpop.f32.mrf.mxu1  ;;  %v650_v14 = vadd.f32 %v1632_v10, %v649_v12 }
  0xd6   : > { %v715_v15 = vadd.f32 %v1633_v11, %v714_v13 }
  0xd7   : > { %v652_v16 = vmul.f32 0.35355338, %v650_v14 }
  0xd8   : > { %750 = vst.msk [vmem:[#allocation3] sm:$0xff] %vm653_vm1, %v715_v15  ;;  %764 = vrot.lane.b32.xlu1 %v715_v15, %s2004_s28  ;;  %753 = vrot.lane.b32.xlu0 %v715_v15, %s2005_s10 }
  0xd9   : > { %654 = vst.msk [vmem:[#allocation2] sm:$0xff] %vm653_vm1, %v652_v16  ;;  %661 = vrot.lane.b32.xlu2 %v652_v16, %s2004_s28 }
  0xde   : > { %v746_v42 = vpop.f32.mrf.mxu2 }
  0xdf   : > { %v788_v17 = vld [vmem:[#allocation3] sm:$0xff]  ;;  %v747_v44 = vadd.f32 %v1634_v40, %v746_v42 }
  0xe0   : > { %774 = vrot.lane.b32.xlu1 %v715_v15, %s2006_s26  ;;  %1481 = vmatpush.xpose.msk.msra.mxu3 %vm653_vm1, %v788_v17  ;;  %v784_v18 = vld [vmem:[#allocation2] sm:$0xff] }
  0xe1   : > { %656 = vrot.lane.b32.xlu0 %v652_v16, %s2005_s10  ;;  %666 = vrot.lane.b32.xlu2 %v652_v16, %s2006_s26  ;;  %751 = vst.msk [vmem:[#allocation4] sm:$0xff] %vm653_vm1, %v747_v44 }
  0xe3   : > { %1482 = vmatmul.msk.f32.vlgmr.msra.gmra.mxu3 %vm653_vm1, %v784_v18 }
  0xe8   : > { %v792_v53 = vld [vmem:[#allocation4] sm:$0xff] }
  0xe9   : > { %1039 = vmatpush.msrb.mxu2 %v792_v53 }
 0x133   : > { %v662_v19 = vpop.permute.xlu2 %661 }
 0x134   : > { %665 = vst.msk [vmem:[#allocation2 + $0x10] sm:$0xff] %vm653_vm1, %v662_v19 }
 0x13b   : > { %v667_v20 = vpop.permute.xlu2 %666  ;;  %v786_v32 = vld [vmem:[#allocation2 + $0x10] sm:$0xff] }
 0x13c   : > { %670 = vst.msk [vmem:[#allocation2 + $0x18] sm:$0xff] %vm653_vm1, %v667_v20 }
 0x143   : > { %v787_v35 = vld [vmem:[#allocation2 + $0x18] sm:$0xff] }
 0x14a   : > { %v765_v23 = vpop.permute.xlu1 %764  ;;  %v754_v24 = vpop.permute.xlu0 %753 }
 0x14b   : > { %768 = vst.msk [vmem:[#allocation3 + $0x10] sm:$0xff] %vm653_vm1, %v765_v23 }
 0x14c   : > { %757 = vst.msk [vmem:[#allocation3 + $0x8] sm:$0xff] %vm653_vm1, %v754_v24 }
 0x152   : > { %v775_v28 = vpop.permute.xlu1 %774  ;;  %v790_v29 = vld [vmem:[#allocation3 + $0x10] sm:$0xff] }
 0x153   : > { %778 = vst.msk [vmem:[#allocation3 + $0x18] sm:$0xff] %vm653_vm1, %v775_v28  ;;  %v657_v30 = vpop.permute.xlu0 %656  ;;  %v789_v31 = vld [vmem:[#allocation3 + $0x8] sm:$0xff]  ;;  %1485 = vmatpush.xpose.msk.msrb.mxu0 %vm653_vm1, %v790_v29 }
 0x154   : > { %660 = vst.msk [vmem:[#allocation2 + $0x8] sm:$0xff] %vm653_vm1, %v657_v30  ;;  %1483 = vmatpush.xpose.msk.msrb.mxu3 %vm653_vm1, %v789_v31 }
 0x156   : > { %1486 = vmatmul.msk.f32.vlgmr.msrb.gmra.mxu0 %vm653_vm1, %v786_v32 }
 0x15a   : > { %v791_v33 = vld [vmem:[#allocation3 + $0x18] sm:$0xff] }
 0x15b   : > { %v785_v34 = vld [vmem:[#allocation2 + $0x8] sm:$0xff]  ;;  %1487 = vmatpush.xpose.msk.msrb.mxu1 %vm653_vm1, %v791_v33 }
 0x15c   : > { %1484 = vmatmul.msk.f32.vlgmr.msrb.gmra.mxu3 %vm653_vm1, %v785_v34  ;;  %v966_v34 = vld [vmem:[#allocation6 + $0x10] sm:$0xff] }
 0x15e   : > { %1488 = vmatmul.msk.f32.vlgmr.msrb.gmra.mxu1 %vm653_vm1, %v787_v35 }
 0x166   : > { %v2294_v36 = vpop.f32.mrf.mxu3 }
 0x167   : > { %v904_v37 = vsel %vm653_vm1, %v2294_v36, -inf }
 0x168   : > { %905 = vmax.xlane.f32.xlu2 %v904_v37 }
 0x1d3   : > { %v871_v41 = vpop.f32.mrf.mxu0 }
 0x1d4   : > { %v910_v43 = vsel %vm653_vm1, %v871_v41, -inf }
 0x1d5   : > { %911 = vmax.xlane.f32.xlu1 %v910_v43 }
 0x1db   : > { %v2317_v46 = vpop.f32.mrf.mxu1  ;;  %v906_v47 = vpop.xlane.xlu2 %905 }
 0x1dc   : > { %v913_v48 = vsel %vm653_vm1, %v2317_v46, -inf  ;;  %v2322_v49 = vmax.f32 %v2315_v45, %v906_v47 }
 0x1dd   : > { %914 = vmax.xlane.f32.xlu2 %v913_v48 }
 0x1de   : > { %1121 = vst.msk [vmem:[#allocation5] sm:$0xff] %vm671_vm2, %v2322_v49  ;;  %v920_v40 = vsub.f32 %v2315_v45, %v2322_v49 }
 0x1df   : > { %v2326_v50 = vpop.f32.mrf.mxu3 }
 0x1e0   : > { %v907_v51 = vsel %vm653_vm1, %v2326_v50, -inf  ;;  %v924_v42 = vmul.f32 1.442695, %v920_v40 }
 0x1e1   : > { %908 = vmax.xlane.f32.xlu0 %v907_v51 }
 0x1ee   : > { %759 = vrot.lane.b32.xlu1 %v747_v44, %s2005_s10 }
 0x248   : > { %v912_v55 = vpop.xlane.xlu1 %911 }
 0x249   : > { %v2334_v56 = vmax.f32 %v2331_v54, %v912_v55  ;;  %v964_v55 = vld [vmem:[#allocation6] sm:$0xff] }
 0x24b   : > { %v922_v57 = vsub.f32 %v2331_v54, %v2334_v56  ;;  %1123 = vst.msk [vmem:[#allocation5 + $0x10] sm:$0xff] %vm671_vm2, %v2334_v56  ;;  %944 = vperm.xlu2 %1630, %v2334_v56  }
 0x24d   : > { %v928_v30 = vmul.f32 1.442695, %v922_v57 }
 0x250   : > { %v915_v59 = vpop.xlane.xlu2 %914 }
 0x251   : > { %v2344_v60 = vmax.f32 %v2341_v58, %v915_v59 }
 0x253   : > { %v923_v62 = vsub.f32 %v2341_v58, %v2344_v60  ;;  %1124 = vst.msk [vmem:[#allocation5 + $0x18] sm:$0xff] %vm671_vm2, %v2344_v60  ;;  %769 = vrot.lane.b32.xlu2 %v747_v44, %s2004_s28  ;;  %949 = vperm.xlu1 %1631, %v2344_v60  }
 0x254   : > { %v909_v63 = vpop.xlane.xlu0 %908 }
 0x255   : > { %v917_v0 = vmax.f32 %v901_v61, %v909_v63  ;;  %v930_v31 = vmul.f32 1.442695, %v923_v62  ;;  %v994_v62 = vld [vmem:[#allocation7 + $0x8] sm:$0xff] }
 0x257   : > { %v921_v1 = vsub.f32 %v901_v61, %v917_v0  ;;  %1122 = vst.msk [vmem:[#allocation5 + $0x8] sm:$0xff] %vm671_vm2, %v917_v0  ;;  %939 = vperm.xlu0 %1629, %v917_v0  }
 0x259   : > { %v926_v15 = vmul.f32 1.442695, %v921_v1 }
 0x25b   : > { %934 = vperm.xlu2 %1630, %v2322_v49   ;;  %779 = vrot.lane.b32.xlu1 %v747_v44, %s2006_s26 }
 0x260   : > { %v760_v2 = vpop.permute.xlu1 %759 }
 0x261   : > { %763 = vst.msk [vmem:[#allocation4 + $0x8] sm:$0xff] %vm653_vm1, %v760_v2 }
 0x268   : > { %v793_v6 = vld [vmem:[#allocation4 + $0x8] sm:$0xff] }
 0x269   : > { %1062 = vmatpush.msra.mxu3 %v793_v6 }
 0x2a5   : > { %v945_v3 = vpop.permute.xlu2 %944 }
 0x2a6   : > { %v954_v4 = vsub.f32 %v871_v41, %v945_v3  ;;  %v967_v41 = vld [vmem:[#allocation6 + $0x18] sm:$0xff] }
 0x2a8   : > { %v960_v5 = vmul.f32 1.442695, %v954_v4 }
 0x2aa   : > { %1636 = vpow2.f32 %v960_v5 }
 0x2ad   : > { %v770_v7 = vpop.permute.xlu2 %769 }
 0x2ae   : > { %773 = vst.msk [vmem:[#allocation4 + $0x10] sm:$0xff] %vm653_vm1, %v770_v7  ;;  %v996_v7 = vld [vmem:[#allocation7 + $0x18] sm:$0xff] }
 0x2b0   : > { %v1637_v8 = vpop.eup %1636 }
 0x2b1   : > { %v978_v9 = vsel %vm653_vm1, %v1637_v8, 0.0 }
 0x2b2   : > { %979 = vadd.xlane.f32.xlu1 %v978_v9 }
 0x2b5   : > { %v935_v10 = vpop.permute.xlu2 %934  ;;  %v794_v11 = vld [vmem:[#allocation4 + $0x10] sm:$0xff] }
 0x2b6   : > { %v952_v12 = vsub.f32 %v2294_v36, %v935_v10  ;;  %1085 = vmatpush.msra.mxu0 %v794_v11 }
 0x2b7   : > { %1491 = vmatmul.msk.f32.vlgmr.msra.gmra.mxu0 %vm653_vm1, %v1637_v8 }
 0x2b8   : > { %v956_v13 = vmul.f32 1.442695, %v952_v12 }
 0x2ba   : > { %1638 = vpow2.f32 %v956_v13 }
 0x2bb   : > { %1640 = vpow2.f32 %v926_v15 }
 0x2c0   : > { %v1639_v14 = vpop.eup %1638 }
 0x2c1   : > { %1489 = vmatmul.msk.f32.vlgmr.msrb.gmra.mxu2 %vm653_vm1, %v1639_v14  ;;  %v1641_v20 = vpop.eup %1640  ;;  %v972_v29 = vsel %vm653_vm1, %v1639_v14, 0.0 }
 0x2c5   : > { %v950_v16 = vpop.permute.xlu1 %949 }
 0x2c6   : > { %v955_v17 = vsub.f32 %v2317_v46, %v950_v16  ;;  %v965_v46 = vld [vmem:[#allocation6 + $0x8] sm:$0xff] }
 0x2c7   : > { %v969_v48 = vmul.f32 %v1641_v20, %v965_v46 }
 0x2c8   : > { %v962_v18 = vmul.f32 1.442695, %v955_v17 }
 0x2c9   : > { %v940_v19 = vpop.permute.xlu0 %939 }
 0x2ca   : > { %1642 = vpow2.f32 %v962_v18  ;;  %v953_v21 = vsub.f32 %v2326_v50, %v940_v19 }
 0x2cb   : > { %1004 = vperm.xlu1 %1631, %v1641_v20  }
 0x2cc   : > { %v958_v22 = vmul.f32 1.442695, %v953_v21  ;;  %v993_v21 = vld [vmem:[#allocation7] sm:$0xff] }
 0x2cd   : > { %v780_v23 = vpop.permute.xlu1 %779 }
 0x2ce   : > { %1644 = vpow2.f32 %v958_v22  ;;  %783 = vst.msk [vmem:[#allocation4 + $0x18] sm:$0xff] %vm653_vm1, %v780_v23 }
 0x2cf   : > { %1646 = vpow2.f32 %v928_v30  ;;  %v1186_v30 = vld [vmem:[#allocation20 + $0x10] sm:$0xff] }
 0x2d0   : > { %v1643_v24 = vpop.eup %1642  ;;  %1648 = vpow2.f32 %v930_v31  ;;  %v1185_v31 = vld [vmem:[#allocation20 + $0x8] sm:$0xff] }
 0x2d1   : > { %v981_v25 = vsel %vm653_vm1, %v1643_v24, 0.0 }
 0x2d2   : > { %982 = vadd.xlane.f32.xlu2 %v981_v25 }
 0x2d4   : > { %v1645_v26 = vpop.eup %1644 }
 0x2d5   : > { %1490 = vmatmul.msk.f32.vlgmr.msra.gmra.mxu3 %vm653_vm1, %v1645_v26  ;;  %v975_v27 = vsel %vm653_vm1, %v1645_v26, 0.0  ;;  %v795_v28 = vld [vmem:[#allocation4 + $0x18] sm:$0xff]  ;;  %v1647_v32 = vpop.eup %1646 }
 0x2d6   : > { %976 = vadd.xlane.f32.xlu0 %v975_v27  ;;  %1108 = vmatpush.msra.mxu1 %v795_v28  ;;  %v1649_v33 = vpop.eup %1648  ;;  %v970_v35 = vmul.f32 %v1647_v32, %v966_v34 }
 0x2d7   : > { %1492 = vmatmul.msk.f32.vlgmr.msra.gmra.mxu1 %vm653_vm1, %v1643_v24  ;;  %v971_v43 = vmul.f32 %v1649_v33, %v967_v41 }
 0x2de   : > { %973 = vadd.xlane.f32.xlu0 %v972_v29  ;;  %v1187_v29 = vld [vmem:[#allocation20 + $0x18] sm:$0xff] }
 0x2df   : > { %1207 = vmatpush.msra.mxu2 %v1187_v29 }
 0x2e1   : > { %1208 = vmatpush.msra.mxu2 %v1186_v30 }
 0x2e3   : > { %1209 = vmatpush.msra.mxu2 %v1185_v31 }
 0x2ea   : > { %1009 = vperm.xlu2 %1630, %v1647_v32   ;;  %v1184_v32 = vld [vmem:[#allocation20] sm:$0xff] }
 0x2eb   : > { %1210 = vmatpush.msra.mxu2 %v1184_v32 }
 0x2f2   : > { %1014 = vperm.xlu0 %1629, %v1649_v33  }
 0x325   : > { %v980_v36 = vpop.xlane.xlu1 %979 }
 0x326   : > { %v986_v37 = vadd.f32 %v980_v36, %v970_v35 }
 0x328   : > { %991 = vst.msk [vmem:[#allocation6 + $0x10] sm:$0xff] %vm671_vm2, %v986_v37 }
 0x32f   : > { %v1130_v38 = vld [vmem:[#allocation6 + $0x10] sm:$0xff] }
 0x330   : > { %1650 = vrcp.f32 %v1130_v38 }
 0x331   : > { %1652 = vpow2.f32 %v924_v42 }
 0x334   : > { %v1087_v45 = vpop.f32.mrf.mxu0 }
 0x336   : > { %v1651_v39 = vpop.eup %1650 }
 0x337   : > { %1152 = vperm.xlu0 %1629, %v1651_v39   ;;  %v1653_v53 = vpop.eup %1652 }
 0x338   : > { %v968_v58 = vmul.f32 %v1653_v53, %v964_v55 }
 0x33d   : > { %v1005_v63 = vpop.permute.xlu1 %1004 }
 0x33e   : > { %v1018_v1 = vmul.f32 %v1005_v63, %v994_v62 }
 0x344   : > { %v1041_v24 = vpop.f32.mrf.mxu2 }
 0x345   : > { %v983_v44 = vpop.xlane.xlu2 %982 }
 0x346   : > { %v987_v47 = vadd.f32 %v983_v44, %v971_v43 }
 0x348   : > { %992 = vst.msk [vmem:[#allocation6 + $0x18] sm:$0xff] %vm671_vm2, %v987_v47 }
 0x349   : > { %v977_v50 = vpop.xlane.xlu0 %976 }
 0x34a   : > { %v985_v51 = vadd.f32 %v977_v50, %v969_v48 }
 0x34c   : > { %990 = vst.msk [vmem:[#allocation6 + $0x8] sm:$0xff] %vm671_vm2, %v985_v51 }
 0x34d   : > { %v1010_v54 = vpop.permute.xlu2 %1009 }
 0x34e   : > { %v1019_v56 = vmul.f32 %v1010_v54, %v995_v52 }
 0x34f   : > { %v1131_v49 = vld [vmem:[#allocation6 + $0x18] sm:$0xff] }
 0x350   : > { %v1115_v57 = vadd.f32 %v1087_v45, %v1019_v56  ;;  %1654 = vrcp.f32 %v1131_v49 }
 0x351   : > { %v974_v59 = vpop.xlane.xlu0 %973 }
 0x352   : > { %1119 = vst.msk [vmem:[#allocation7 + $0x10] sm:$0xff] %vm653_vm1, %v1115_v57  ;;  %v984_v60 = vadd.f32 %v974_v59, %v968_v58 }
 0x353   : > { %v1129_v61 = vld [vmem:[#allocation6 + $0x8] sm:$0xff] }
 0x354   : > { %989 = vst.msk [vmem:[#allocation6] sm:$0xff] %vm671_vm2, %v984_v60  ;;  %1656 = vrcp.f32 %v1129_v61  ;;  %v1110_v10 = vpop.f32.mrf.mxu1 }
 0x356   : > { %v1655_v0 = vpop.eup %1654 }
 0x357   : > { %1157 = vperm.xlu2 %1630, %v1655_v0  }
 0x358   : > { %v1064_v2 = vpop.f32.mrf.mxu3 }
 0x359   : > { %v1114_v3 = vadd.f32 %v1064_v2, %v1018_v1  ;;  %v1138_v12 = vld [vmem:[#allocation7 + $0x10] sm:$0xff] }
 0x35a   : > { %v1657_v4 = vpop.eup %1656 }
 0x35b   : > { %1118 = vst.msk [vmem:[#allocation7 + $0x8] sm:$0xff] %vm653_vm1, %v1114_v3  ;;  %1147 = vperm.xlu1 %1631, %v1657_v4   ;;  %v1128_v5 = vld [vmem:[#allocation6] sm:$0xff] }
 0x35c   : > { %1658 = vrcp.f32 %v1128_v5 }
 0x362   : > { %v1659_v6 = vpop.eup %1658  ;;  %v1137_v18 = vld [vmem:[#allocation7 + $0x8] sm:$0xff] }
 0x363   : > { %1142 = vperm.xlu0 %1629, %v1659_v6   ;;  %999 = vperm.xlu1 %1631, %v1653_v53  }
 0x364   : > { %v1015_v8 = vpop.permute.xlu0 %1014 }
 0x365   : > { %v1020_v9 = vmul.f32 %v1015_v8, %v996_v7 }
 0x367   : > { %v1116_v11 = vadd.f32 %v1110_v10, %v1020_v9 }
 0x369   : > { %1120 = vst.msk [vmem:[#allocation7 + $0x18] sm:$0xff] %vm653_vm1, %v1116_v11 }
 0x370   : > { %v1139_v16 = vld [vmem:[#allocation7 + $0x18] sm:$0xff] }
 0x3a9   : > { %v1153_v13 = vpop.permute.xlu0 %1152 }
 0x3aa   : > { %v1162_v14 = vmul.f32 %v1153_v13, %v1138_v12 }
 0x3ac   : > { %1172 = vrot.lane.b32.xlu1 %v1162_v14, %s2010_s11 }
 0x3b1   : > { %v1158_v15 = vpop.permute.xlu2 %1157 }
 0x3b2   : > { %v1163_v17 = vmul.f32 %v1158_v15, %v1139_v16 }
 0x3b4   : > { %1178 = vrot.lane.b32.xlu0 %v1163_v17, %s2011_s14 }
 0x3cd   : > { %v1148_v19 = vpop.permute.xlu1 %1147 }
 0x3ce   : > { %v1161_v20 = vmul.f32 %v1148_v19, %v1137_v18 }
 0x3d0   : > { %1166 = vrot.lane.b32.xlu2 %v1161_v20, %s2012_s3 }
 0x3d5   : > { %v1000_v22 = vpop.permute.xlu1 %999  ;;  %v1143_v26 = vpop.permute.xlu0 %1142 }
 0x3d6   : > { %v1017_v23 = vmul.f32 %v1000_v22, %v993_v21 }
 0x3d8   : > { %v1113_v25 = vadd.f32 %v1041_v24, %v1017_v23 }
 0x3da   : > { %1117 = vst.msk [vmem:[#allocation7] sm:$0xff] %vm653_vm1, %v1113_v25 }
 0x3e1   : > { %v1136_v27 = vld [vmem:[#allocation7] sm:$0xff] }
 0x3e2   : > { %v1160_v28 = vmul.f32 %v1143_v26, %v1136_v27 }
 0x3e4   : > { %1164 = vst.msk [vmem:[#allocation8] sm:$0xff] %vm653_vm1, %v1160_v28 }
 0x41e   : > { %v1173_v34 = vpop.permute.xlu1 %1172 }
 0x426   : > { %v1179_v35 = vpop.permute.xlu0 %1178 }
 0x42a   : > { %v1167_v33 = vpop.permute.xlu2 %1166 }
 0x42b   : > { %1170 = vst.msk [vmem:[#allocation8] sm:$0xff] %vm1169_vm3, %v1167_v33 }
 0x42c   : > { %1176 = vst.msk [vmem:[#allocation8] sm:$0xff] %vm1175_vm4, %v1173_v34 }
 0x42d   : > { %1182 = vst.msk [vmem:[#allocation8] sm:$0xff] %vm1181_vm5, %v1179_v35 }
 0x434   : > { %v1183_v36 = vld [vmem:[#allocation8] sm:$0xff] }
 0x435   : > { %1493 = vmatmul.msk.f32.vlgmr.msra.gmra.mxu2 %vm628_vm0, %v1183_v36  ;;  %1216 = vst.msk [vmem:[%s614_s25] sm:$0xff] %vm628_vm0, %v1183_v36 }
 0x436   : > { %1897 = shalt.err (!%p1894_p13)
}
 0x437   : > { %1523 = dma.vmem_to_hbm [thread:$0]  (%p2166_p2), %s1252_s12, 128, %s1254_s13, %s1223_s18  }
 0x438   : > { %s2501_s17 = sld [smem:[#allocation43_spill]]  ;;  %s607_s16 = scalar_lea.vmem [#allocation21], %s2238_s4 }
 0x439   : > { %s2502_s25 = sld [smem:[#allocation42_spill]]  ;;  %s1236_s5 = sshll.u32 %s607_s16, 4  ;;  %s1237_s5 = int_to_ptr.vmem [resolvable:$true] %s1236_s5 }
 0x43a   : > { %s1218_s27 = scalar_lea.sflag [#allocation11], %s2235_s21 }
 0x43e   : > { %s1234_s11 = scalar_lea.hbm %s2501_s17, %s1496_s30  ;;  %s1918_s4 = scalar_lea.hbm %s2501_s17, 16 }
 0x43f   : > { %v1635_v37 = vld [vmem:[%s2502_s25] ss:$0 sm:$0xff]  ;;  %s1238_s0 = sshll.u32 %s1234_s11, 4  ;;  %s1239_s0 = int_to_ptr.hbm [resolvable:$true] %s1238_s0 }
 0x440   : > { %s1912_s12 = sshra.s32 %s1239_s0, 4  ;;  %s1913_s12 = int_to_ptr.hbm [resolvable:$true] %s1912_s12 }
 0x441   : > { %s1914_s13 = scalar_lea.hbm %s1913_s12, 8  ;;  %p1919_p8 = scmp.lt.s32.totalorder %s1913_s12, %s2501_s17 }
 0x442   : > { %p1915_p0 = scmp.ne.s32.totalorder %s1913_s12, %s1914_s13  ;;  %p1920_p1 = scmp.lt.s32.totalorder %s1918_s4, %s1914_s13 }
 0x444   : > { %p1916_p4 = pnand %p1915_p0, %p2166_p2  ;;  %p1921_p3 = por %p1920_p1, %p1919_p8 }
 0x446   : > { %p1917_p9 = pneg %p1916_p4 }
 0x448   : > { %p1922_p5 = pnand %p1921_p3, %p1917_p9 }
 0x4b8   : > { %v1212_v38 = vpop.f32.mrf.mxu2 }
 0x4b9   : > { %v1213_v39 = vadd.f32 %v1635_v37, %v1212_v38 }
 0x4bb   : > { %1215 = vst.msk [vmem:[%s607_s16] sm:$0xff] %vm628_vm0, %v1213_v39 }
 0x4bc   : > { %1925 = shalt.err (!%p1922_p5)
}
 0x4bd   : > { %1522 = dma.vmem_to_hbm [thread:$0]  (%p2166_p2), %s1237_s5, 128, %s1239_s0, %s1218_s27  }
 0x4be PF: > { %s2503_s21 = sld [smem:[#allocation30_spill]]  ;;  %p1550_p10 = pnand %p1461_p6, %p2173_p7 }
 0x4bf   : > { %s2505_s24 = sld [smem:[#allocation32_spill]] }
 0x4c0   : > { %p1551_p11 = pneg %p1550_p10 }
 0x4c4   : > { %s1265_s28 = sand.u32 1, %s2503_s21  }
 0x4c5   : > { %s1266_s10 = scalar_lea.sflag [#allocation11], %s1265_s28 }
 0x4c6   : > { %1967 = dma.done.wait (%p1551_p11), %s1266_s10, 128  }
 0x4c7   : > { %1969 = vsyncadd (%p1551_p11), %s1266_s10, 4294967168  ;;  %s1276_s26 = scalar_lea.sflag [#allocation23], %s1265_s28 }
 0x4c8   : > { %1971 = dma.done.wait (%p1551_p11), %s1276_s26, 128  }
 0x4c9   : > { %1973 = vsyncadd (%p1551_p11), %s1276_s26, 4294967168  ;;  %s37_s26 = sadd.s32 1, %s2505_s24   ;;  %s2506_s29 = sld [smem:[#allocation34_spill]] }
 0x4ca   : > { %p34_p12 = scmp.ge.s32.totalorder %s37_s26, 4   ;;  %s2507_s24 = sld [smem:[#allocation31_spill]] }
 0x4cb   : > { %s2508_s25 = sld [smem:[#allocation33_spill]]  ;;  %s2509_s21 = smov %s1980_s22 }
 0x4cc   : > { %s2510_s22 = smov %s1984_s23  ;;  %36 = sbr.rel (!%p34_p12) target bundleno = 22 (0x16), region = 183 }
 0x4cf   : > { %s2511_s23 = smov %s2506_s29 }
 0x4d1   :  { %1282 = vsyncpa [#allocation10], 1 }
 0x4d2   :  { %1284 = vsyncpa [#allocation10 + $0x1], 1 }
 0x4d3   :  { %1285 = vsyncpa [#allocation13], 1 }
 0x4d4   :  { %1287 = vsyncpa [#allocation13 + $0x1], 1 }
 0x4d5   :  { %1288 = vsyncpa [#allocation16], 1 }
 0x4d6   :  { %1289 = vsyncpa [#allocation19], 1 }
 0x4d7   :  { %1290 = vsyncpa [#allocation11], 1 }
 0x4d8   :  { %1292 = vsyncpa [#allocation11 + $0x1], 1 }
 0x4d9   :  { %1293 = vsyncpa [#allocation23], 1 }
 0x4da   :  { %1295 = vsyncpa [#allocation23 + $0x1], 1 }

</bundles_post_ra>
